<compile_context>
chip_gen: v7x
topology: tpu7x:2x2x1
jax: 0.10.0
libtpu: 0.0.40
codegen_flags: <defaults>
</compile_context>

<pallas_src>
import functools

import jax
import jax.numpy as jnp
from jax.experimental import pallas as pl
from jax.experimental.pallas import tpu as pltpu

BN_EPS = 1e-5
LN_EPS = 1e-5


def _round_up(x, m):
    return ((x + m - 1) // m) * m


# --------------------------------------------------------------------------
# Kernel
# --------------------------------------------------------------------------
def _emissions_kernel(hidden_dims, hidden_pads, x_ref, *refs):
    """One batch tile, full fused forward pass.

    refs = (w_cat_0, ..., w_cat_{L-1}, vec_pack, out)
      w_cat_i : (d_in_pad_i, 2*hp_i) bf16
                columns [0:h_i]        = BN-folded main weight
                columns [hp_i:hp_i+h_i] = residual weight   (rest zero)
      vec_pack: (rows, Wmax) f32
                row li           : fused main bias | residual bias (lane-aligned)
                row L            : gw = ln_gamma * w_out          (padded w/ 0)
                row L+1, col 0/1 : sum(gw) , c = sum(ln_beta*w_out)+b_out
    """
    n_hidden = len(hidden_dims)
    w_refs = refs[:n_hidden]
    vec_ref = refs[n_hidden]
    o_ref = refs[n_hidden + 1]

    vp = vec_ref[...]                              # (rows, Wmax) f32
    x = x_ref[...]                                 # (tile_b, input_dim) bf16

    for li, hp in enumerate(hidden_pads):
        w_cat = w_refs[li][...]                    # (d_in_pad, 2*hp) bf16
        full = jnp.dot(x.astype(jnp.bfloat16), w_cat,
                       preferred_element_type=jnp.float32)        # (tile_b, 2*hp)
        full = full + vp[li:li + 1, :2 * hp]                       # fused biases
        # ReLU(main) + residual; both halves start on 128-lane boundaries.
        # Dropout = identity (eval mode). Padded lanes stay exactly 0.
        x = jnp.maximum(full[:, :hp], 0.0) + full[:, hp:2 * hp]    # f32 (tile_b, hp)

    h_last = hidden_dims[-1]
    hp_last = hidden_pads[-1]
    gw = vp[n_hidden:n_hidden + 1, :hp_last]           # ln_g * w_out (0-padded)
    sum_gw = vp[n_hidden + 1:n_hidden + 2, 0:1]        # scalar sum(gw)
    c = vp[n_hidden + 1:n_hidden + 2, 1:2]             # scalar sum(ln_b*w_out)+b_out

    # LayerNorm (biased variance) + output projection, folded:
    #   out = rsqrt(var+eps) * (sum(x*gw) - mean*sum_gw) + c
    # Padded lanes of x are 0, so sums over the full lane width equal sums
    # over the real h_last features; divide by h_last.
    inv_n = 1.0 / float(h_last)
    mean = jnp.sum(x, axis=-1, keepdims=True) * inv_n
    ex2 = jnp.sum(x * x, axis=-1, keepdims=True) * inv_n
    var = ex2 - mean * mean
    s_gw = jnp.sum(x * gw, axis=-1, keepdims=True)
    out = jax.lax.rsqrt(var + LN_EPS) * (s_gw - mean * sum_gw) + c  # (tile_b, 1)
    o_ref[...] = out.astype(o_ref.dtype)


# --------------------------------------------------------------------------
# Parameter construction (torch-like) and kernel-side preparation
# --------------------------------------------------------------------------
def init_params(key, input_dim, hidden_dims):
    """Deterministic He (kaiming_normal, fan_in, relu) init; biases = 0.

    Layout mirrors the PyTorch module (eval mode): per hidden layer
      [w, b, bn_gamma, bn_beta, bn_running_mean, bn_running_var, rw, rb]
    then [ln_gamma, ln_beta, w_out, b_out].  Weights stored (in, out).
    """
    params = []
    dims = [input_dim] + list(hidden_dims)

    def kaiming(k, fan_in, fan_out):
        std = (2.0 / fan_in) ** 0.5
        return (std * jax.random.normal(k, (fan_out, fan_in), jnp.float32)).T

    for i in range(len(hidden_dims)):
        d_in, d_out = dims[i], dims[i + 1]
        key, k1, k2 = jax.random.split(key, 3)
        params.append(kaiming(k1, d_in, d_out))                    # layer weight
        params.append(jnp.zeros((1, d_out), jnp.float32))          # layer bias
        params.append(jnp.ones((1, d_out), jnp.float32))           # BN gamma
        params.append(jnp.zeros((1, d_out), jnp.float32))          # BN beta
        params.append(jnp.zeros((1, d_out), jnp.float32))          # BN running mean
        params.append(jnp.ones((1, d_out), jnp.float32))           # BN running var
        params.append(kaiming(k2, d_in, d_out))                    # residual weight
        params.append(jnp.zeros((1, d_out), jnp.float32))          # residual bias

    key, k_out = jax.random.split(key)
    params.append(jnp.ones((1, hidden_dims[-1]), jnp.float32))     # LN gamma
    params.append(jnp.zeros((1, hidden_dims[-1]), jnp.float32))    # LN beta
    params.append(kaiming(k_out, hidden_dims[-1], 1))              # output weight (h,1)
    params.append(jnp.zeros((1, 1), jnp.float32))                  # output bias
    return params


def fold_and_pack_params(params, input_dim, hidden_dims):
    """Fold eval-mode BN into the main Linear, concat main|residual weights
    with 128-lane alignment, and fold LN-affine + output projection.

    Returns (w_cats, vec_pack):
      w_cats  : list of (d_in_pad, 2*hp) bf16 arrays, one per hidden layer
      vec_pack: (rows, Wmax) f32 (see kernel docstring for row layout)
    """
    n_hidden = len(hidden_dims)
    h_pads = [_round_up(h, 128) for h in hidden_dims]
    dims = [input_dim] + list(hidden_dims)
    dims_pad = [input_dim] + h_pads          # carried-activation width per layer

    w_cats = []
    vec_rows = []
    idx = 0
    for i in range(n_hidden):
        w, b, g, be, rm, rv, rw, rb = params[idx:idx + 8]
        idx += 8
        h, hp = hidden_dims[i], h_pads[i]
        d_in, d_in_pad = dims[i], dims_pad[i]

        scale = g * jax.lax.rsqrt(rv + BN_EPS)             # (1, h)
        w_folded = w * scale                               # (d_in, h)
        b_folded = (b - rm) * scale + be                   # (1, h)

        w_cat = jnp.zeros((d_in_pad, 2 * hp), jnp.float32)
        w_cat = w_cat.at[:d_in, :h].set(w_folded)          # main  -> lanes [0,h)
        w_cat = w_cat.at[:d_in, hp:hp + h].set(rw)         # resid -> lanes [hp,hp+h)
        w_cats.append(w_cat.astype(jnp.bfloat16))

        row = jnp.zeros((2 * hp,), jnp.float32)
        row = row.at[:h].set(b_folded[0]).at[hp:hp + h].set(rb[0])
        vec_rows.append(row)

    ln_g, ln_b, w_out, b_out = params[idx:idx + 4]
    h_last, hp_last = hidden_dims[-1], h_pads[-1]
    gw = ln_g[0] * w_out[:, 0]                             # (h_last,)
    gw_row = jnp.zeros((hp_last,), jnp.float32).at[:h_last].set(gw)
    vec_rows.append(gw_row)
    sum_gw = jnp.sum(gw)
    c = jnp.sum(ln_b[0] * w_out[:, 0]) + b_out[0, 0]

    w_max = max(128, max(r.shape[0] for r in vec_rows))
    n_rows = _round_up(len(vec_rows) + 1, 8)
    vec_pack = jnp.zeros((n_rows, w_max), jnp.float32)
    for ri, r in enumerate(vec_rows):
        vec_pack = vec_pack.at[ri, :r.shape[0]].set(r)
    vec_pack = vec_pack.at[len(vec_rows), 0].set(sum_gw)
    vec_pack = vec_pack.at[len(vec_rows), 1].set(c)
    return w_cats, vec_pack


# --------------------------------------------------------------------------
# Wrapper
# --------------------------------------------------------------------------
def _choose_tile_b(batch, max_tile=1024):
    """Large tile (amortize per-step overhead) but keep >= 2 grid steps so the
    batch axis can shard across v7x's two TensorCores. Multiple of 16."""
    if batch <= 16:
        return max(16, _round_up(batch, 16))
    half = _round_up(pl.cdiv(batch, 2), 16)
    return max(16, min(max_tile, half))


def _vmem_estimate_bytes(tile_b, input_dim, hidden_dims):
    h_pads = [_round_up(h, 128) for h in hidden_dims]
    hp_max = max(h_pads)
    resident = 0
    d_in = input_dim
    for hp in h_pads:
        resident += d_in * (2 * hp) * 2        # bf16 w_cat
        d_in = hp
    resident += 8 * max(2 * hp_max, 128) * 4   # vec_pack
    resident *= 2                              # (conservative) double-buffered
    io = 2 * tile_b * input_dim * 2 + 2 * tile_b * 4          # x bf16, out f32
    interm = tile_b * (2 * hp_max) * 4 + 2 * tile_b * hp_max * 4
    return resident + io + interm


def emissions_forward(x, w_cats, vec_pack, hidden_dims, *, tile_b=None):
    """x: (batch, input_dim). Returns (batch, 1) f32. Best perf if x is bf16."""
    batch, input_dim = x.shape
    n_hidden = len(hidden_dims)
    h_pads = [_round_up(h, 128) for h in hidden_dims]

    if x.dtype != jnp.bfloat16:
        x = x.astype(jnp.bfloat16)     # halve x HBM traffic into the kernel

    if tile_b is None:
        tile_b = _choose_tile_b(batch)

    # VMEM budget: keep comfortably under v7x's 64 MiB per-TC physical VMEM
    # (128 MiB on v5e/v6e). A future hidden_dims bump trips this assert
    # instead of silently regressing on v7x.
    est = _vmem_estimate_bytes(tile_b, input_dim, hidden_dims)
    assert est < 48 * 1024 * 1024, (
        f"VMEM working set estimate {est/2**20:.1f} MiB too large for v7x; "
        "reduce tile_b or hidden_dims")
    vmem_limit = int(min(max(2 * est, 32 * 1024 * 1024), 56 * 1024 * 1024))

    # No wrapper-side pad: grid covers the batch with a (masked) partial last
    # block. Safe because every op in the kernel is row-independent and the
    # out-of-bounds rows are never written back.
    grid = (pl.cdiv(batch, tile_b),)

    in_specs = (
        [pl.BlockSpec((tile_b, input_dim), lambda i: (i, 0))]          # x: tiled
        + [pl.BlockSpec(w.shape, lambda i: (0, 0)) for w in w_cats]    # weights resident
        + [pl.BlockSpec(vec_pack.shape, lambda i: (0, 0))]             # packed vectors
    )
    out_specs = pl.BlockSpec((tile_b, 1), lambda i: (i, 0))

    kernel = functools.partial(_emissions_kernel, tuple(hidden_dims), tuple(h_pads))
    out = pl.pallas_call(
        kernel,
        out_shape=jax.ShapeDtypeStruct((batch, 1), jnp.float32),
        grid=grid,
        in_specs=in_specs,
        out_specs=out_specs,
        compiler_params=pltpu.CompilerParams(
            dimension_semantics=("parallel",),     # shard batch tiles over v7x's 2 TCs
            vmem_limit_bytes=vmem_limit),
    )(x, *w_cats, vec_pack)
    return out


# --------------------------------------------------------------------------
# References
# --------------------------------------------------------------------------
def reference_forward_torch(x, params, n_hidden):
    """Pure-JAX f32 mirror of the PyTorch eval-mode forward (unfolded BN)."""
    identity = x
    idx = 0
    for _ in range(n_hidden):
        w, b, g, be, rm, rv, rw, rb = params[idx:idx + 8]
        idx += 8
        h = x @ w + b
        h = (h - rm) / jnp.sqrt(rv + BN_EPS) * g + be
        h = jnp.maximum(h, 0.0)
        identity = identity @ rw + rb
        x = h + identity          # shapes always match -> residual add each layer
        identity = x
    ln_g, ln_b, w_out, b_out = params[idx:idx + 4]
    mean = jnp.mean(x, axis=-1, keepdims=True)
    var = jnp.mean((x - mean) ** 2, axis=-1, keepdims=True)
    x = (x - mean) / jnp.sqrt(var + LN_EPS) * ln_g + ln_b
    return x @ w_out + b_out


def reference_forward_kernel_math(x, w_cats, vec_pack, hidden_dims):
    """Pure-JAX mirror of the exact kernel math (folded BN/LN, bf16 inputs)."""
    n_hidden = len(hidden_dims)
    h_pads = [_round_up(h, 128) for h in hidden_dims]
    xb = x.astype(jnp.bfloat16)
    for li, hp in enumerate(h_pads):
        full = jnp.dot(xb.astype(jnp.bfloat16), w_cats[li],
                       preferred_element_type=jnp.float32)
        full = full + vec_pack[li:li + 1, :2 * hp]
        xb = jnp.maximum(full[:, :hp], 0.0) + full[:, hp:2 * hp]
    h_last, hp_last = hidden_dims[-1], h_pads[-1]
    gw = vec_pack[n_hidden:n_hidden + 1, :hp_last]
    sum_gw = vec_pack[n_hidden + 1, 0]
    c = vec_pack[n_hidden + 1, 1]
    inv_n = 1.0 / float(h_last)
    mean = jnp.sum(xb, axis=-1, keepdims=True) * inv_n
    ex2 = jnp.sum(xb * xb, axis=-1, keepdims=True) * inv_n
    var = ex2 - mean * mean
    s_gw = jnp.sum(xb * gw, axis=-1, keepdims=True)
    return jax.lax.rsqrt(var + LN_EPS) * (s_gw - mean * sum_gw) + c


# --------------------------------------------------------------------------
if __name__ == "__main__":
    input_dim = 16
    hidden_dims = [128, 64, 32]
    batch = 256

    key = jax.random.PRNGKey(0)
    key, kx = jax.random.split(key)
    x_f32 = jax.random.normal(kx, (batch, input_dim), jnp.float32)
    x_bf16 = x_f32.astype(jnp.bfloat16)     # feed the kernel bf16 directly

    params = init_params(key, input_dim, hidden_dims)
    w_cats, vec_pack = fold_and_pack_params(params, input_dim, hidden_dims)

    # tile_b auto-chosen: 128 here (>= 2 grid steps for v7x); scales to 1024
    # for large batches.
    out = emissions_forward(x_bf16, w_cats, vec_pack, hidden_dims)
    out = jax.block_until_ready(out)
    assert out.shape == (batch, 1), out.shape

    # Tight check vs a reference doing exactly the kernel's folded/bf16 math.
    ref_exact = reference_forward_kernel_math(x_bf16, w_cats, vec_pack, hidden_dims)
    assert jnp.allclose(out, ref_exact, atol=1e-2, rtol=1e-2), (
        float(jnp.max(jnp.abs(out - ref_exact))))

    # Sanity check vs the full-precision torch-semantics reference
    # (looser: bf16 inputs/weights vs f32).
    ref_torch = reference_forward_torch(x_f32, params, len(hidden_dims))
    assert jnp.allclose(out, ref_torch, atol=1e-1, rtol=1e-1), (
        float(jnp.max(jnp.abs(out - ref_torch))))

    print("KERNEL_OK")
</pallas_src>

<mosaic_0001>
module attributes {stable_mosaic.version = 11 : i64} {
  func.func @_emissions_kernel(%arg0: i32, %arg1: memref<128x16xbf16, #tpu.memory_space<vmem>>, %arg2: memref<16x256xbf16, #tpu.memory_space<vmem>>, %arg3: memref<128x256xbf16, #tpu.memory_space<vmem>>, %arg4: memref<128x256xbf16, #tpu.memory_space<vmem>>, %arg5: memref<8x256xf32, #tpu.memory_space<vmem>>, %arg6: memref<128x1xf32, #tpu.memory_space<vmem>>) attributes {dimension_semantics = [#tpu.dimension_semantics<parallel>], iteration_bounds = array<i64: 2>, scalar_prefetch = 0 : i64, scratch_operands = 0 : i64, tpu.core_type = #tpu.core_type<tc>, window_params = [{transform_indices = @transform_0, window_bounds = array<i64: 128, 16>}, {pipeline_mode = #tpu.pipeline_mode<synchronous>, transform_indices = @transform_1, window_bounds = array<i64: 16, 256>}, {pipeline_mode = #tpu.pipeline_mode<synchronous>, transform_indices = @transform_2, window_bounds = array<i64: 128, 256>}, {pipeline_mode = #tpu.pipeline_mode<synchronous>, transform_indices = @transform_3, window_bounds = array<i64: 128, 256>}, {pipeline_mode = #tpu.pipeline_mode<synchronous>, transform_indices = @transform_4, window_bounds = array<i64: 8, 256>}, {transform_indices = @transform_5, window_bounds = array<i64: 128, 1>}]} {
    %c0 = arith.constant 0 : index
    %c0_0 = arith.constant 0 : index
    %0 = vector.load %arg5[%c0, %c0_0] : memref<8x256xf32, #tpu.memory_space<vmem>>, vector<8x256xf32>
    %c0_1 = arith.constant 0 : index
    %c0_2 = arith.constant 0 : index
    %1 = vector.load %arg1[%c0_1, %c0_2] : memref<128x16xbf16, #tpu.memory_space<vmem>>, vector<128x16xbf16>
    %c0_3 = arith.constant 0 : index
    %c0_4 = arith.constant 0 : index
    %2 = vector.load %arg2[%c0_3, %c0_4] : memref<16x256xbf16, #tpu.memory_space<vmem>>, vector<16x256xbf16>
    %cst = arith.constant dense<0.000000e+00> : vector<128x256xf32>
    %3 = tpu.matmul %1, %2, %cst {dimension_numbers = #tpu.dot_dimension_numbers<[1], [0], [0], [1], [0, 0, 1, 1], [], []>} : vector<128x16xbf16>, vector<16x256xbf16>, vector<128x256xf32> -> vector<128x256xf32>
    %4 = vector.extract_strided_slice %0 {offsets = [0, 0], sizes = [1, 256], strides = [1, 1]} : vector<8x256xf32> to vector<1x256xf32>
    %5 = vector.broadcast %4 : vector<1x256xf32> to vector<128x256xf32>
    %6 = arith.addf %3, %5 : vector<128x256xf32>
    %7 = vector.extract_strided_slice %6 {offsets = [0, 0], sizes = [128, 128], strides = [1, 1]} : vector<128x256xf32> to vector<128x128xf32>
    %cst_5 = arith.constant 0.000000e+00 : f32
    %8 = vector.broadcast %cst_5 : f32 to vector<128x128xf32>
    %9 = arith.maximumf %7, %8 : vector<128x128xf32>
    %10 = vector.extract_strided_slice %6 {offsets = [0, 128], sizes = [128, 128], strides = [1, 1]} : vector<128x256xf32> to vector<128x128xf32>
    %11 = arith.addf %9, %10 : vector<128x128xf32>
    %c0_6 = arith.constant 0 : index
    %c0_7 = arith.constant 0 : index
    %12 = vector.load %arg3[%c0_6, %c0_7] : memref<128x256xbf16, #tpu.memory_space<vmem>>, vector<128x256xbf16>
    %13 = arith.truncf %11 : vector<128x128xf32> to vector<128x128xbf16>
    %cst_8 = arith.constant dense<0.000000e+00> : vector<128x256xf32>
    %14 = tpu.matmul %13, %12, %cst_8 {dimension_numbers = #tpu.dot_dimension_numbers<[1], [0], [0], [1], [0, 0, 1, 1], [], []>} : vector<128x128xbf16>, vector<128x256xbf16>, vector<128x256xf32> -> vector<128x256xf32>
    %15 = vector.extract_strided_slice %0 {offsets = [1, 0], sizes = [1, 256], strides = [1, 1]} : vector<8x256xf32> to vector<1x256xf32>
    %16 = vector.broadcast %15 : vector<1x256xf32> to vector<128x256xf32>
    %17 = arith.addf %14, %16 : vector<128x256xf32>
    %18 = vector.extract_strided_slice %17 {offsets = [0, 0], sizes = [128, 128], strides = [1, 1]} : vector<128x256xf32> to vector<128x128xf32>
    %cst_9 = arith.constant 0.000000e+00 : f32
    %19 = vector.broadcast %cst_9 : f32 to vector<128x128xf32>
    %20 = arith.maximumf %18, %19 : vector<128x128xf32>
    %21 = vector.extract_strided_slice %17 {offsets = [0, 128], sizes = [128, 128], strides = [1, 1]} : vector<128x256xf32> to vector<128x128xf32>
    %22 = arith.addf %20, %21 : vector<128x128xf32>
    %c0_10 = arith.constant 0 : index
    %c0_11 = arith.constant 0 : index
    %23 = vector.load %arg4[%c0_10, %c0_11] : memref<128x256xbf16, #tpu.memory_space<vmem>>, vector<128x256xbf16>
    %24 = arith.truncf %22 : vector<128x128xf32> to vector<128x128xbf16>
    %cst_12 = arith.constant dense<0.000000e+00> : vector<128x256xf32>
    %25 = tpu.matmul %24, %23, %cst_12 {dimension_numbers = #tpu.dot_dimension_numbers<[1], [0], [0], [1], [0, 0, 1, 1], [], []>} : vector<128x128xbf16>, vector<128x256xbf16>, vector<128x256xf32> -> vector<128x256xf32>
    %26 = vector.extract_strided_slice %0 {offsets = [2, 0], sizes = [1, 256], strides = [1, 1]} : vector<8x256xf32> to vector<1x256xf32>
    %27 = vector.broadcast %26 : vector<1x256xf32> to vector<128x256xf32>
    %28 = arith.addf %25, %27 : vector<128x256xf32>
    %29 = vector.extract_strided_slice %28 {offsets = [0, 0], sizes = [128, 128], strides = [1, 1]} : vector<128x256xf32> to vector<128x128xf32>
    %cst_13 = arith.constant 0.000000e+00 : f32
    %30 = vector.broadcast %cst_13 : f32 to vector<128x128xf32>
    %31 = arith.maximumf %29, %30 : vector<128x128xf32>
    %32 = vector.extract_strided_slice %28 {offsets = [0, 128], sizes = [128, 128], strides = [1, 1]} : vector<128x256xf32> to vector<128x128xf32>
    %33 = arith.addf %31, %32 : vector<128x128xf32>
    %34 = vector.extract_strided_slice %0 {offsets = [3, 0], sizes = [1, 128], strides = [1, 1]} : vector<8x256xf32> to vector<1x128xf32>
    %35 = vector.extract_strided_slice %0 {offsets = [4, 0], sizes = [1, 1], strides = [1, 1]} : vector<8x256xf32> to vector<1x1xf32>
    %36 = vector.extract_strided_slice %0 {offsets = [4, 1], sizes = [1, 1], strides = [1, 1]} : vector<8x256xf32> to vector<1x1xf32>
    %cst_14 = arith.constant dense<0.000000e+00> : vector<128xf32>
    %37 = vector.multi_reduction <add>, %33, %cst_14 [1] : vector<128x128xf32> to vector<128xf32>
    %38 = vector.shape_cast %37 : vector<128xf32> to vector<128x1xf32>
    %cst_15 = arith.constant 3.125000e-02 : f32
    %39 = vector.broadcast %cst_15 : f32 to vector<128x1xf32>
    %40 = arith.mulf %38, %39 : vector<128x1xf32>
    %41 = arith.mulf %33, %33 : vector<128x128xf32>
    %cst_16 = arith.constant dense<0.000000e+00> : vector<128xf32>
    %42 = vector.multi_reduction <add>, %41, %cst_16 [1] : vector<128x128xf32> to vector<128xf32>
    %43 = vector.shape_cast %42 : vector<128xf32> to vector<128x1xf32>
    %cst_17 = arith.constant 3.125000e-02 : f32
    %44 = vector.broadcast %cst_17 : f32 to vector<128x1xf32>
    %45 = arith.mulf %43, %44 : vector<128x1xf32>
    %46 = arith.mulf %40, %40 : vector<128x1xf32>
    %47 = arith.subf %45, %46 : vector<128x1xf32>
    %48 = vector.broadcast %34 : vector<1x128xf32> to vector<128x128xf32>
    %49 = arith.mulf %33, %48 : vector<128x128xf32>
    %cst_18 = arith.constant dense<0.000000e+00> : vector<128xf32>
    %50 = vector.multi_reduction <add>, %49, %cst_18 [1] : vector<128x128xf32> to vector<128xf32>
    %51 = vector.shape_cast %50 : vector<128xf32> to vector<128x1xf32>
    %cst_19 = arith.constant 9.99999974E-6 : f32
    %52 = vector.broadcast %cst_19 : f32 to vector<128x1xf32>
    %53 = arith.addf %47, %52 : vector<128x1xf32>
    %54 = math.rsqrt %53 : vector<128x1xf32>
    %55 = vector.broadcast %35 : vector<1x1xf32> to vector<128x1xf32>
    %56 = arith.mulf %40, %55 : vector<128x1xf32>
    %57 = arith.subf %51, %56 : vector<128x1xf32>
    %58 = arith.mulf %54, %57 : vector<128x1xf32>
    %59 = vector.broadcast %36 : vector<1x1xf32> to vector<128x1xf32>
    %60 = arith.addf %58, %59 : vector<128x1xf32>
    %c0_20 = arith.constant 0 : index
    %c0_21 = arith.constant 0 : index
    %61 = vector.load %arg6[%c0_20, %c0_21] : memref<128x1xf32, #tpu.memory_space<vmem>>, vector<128x1xf32>
    tpu.vector_store %arg6[%c0_20, %c0_21], %60 {strides = array<i32>} : memref<128x1xf32, #tpu.memory_space<vmem>>, vector<128x1xf32>,
    return
  }
  func.func @transform_0(%arg0: i32) -> (i32, i32) {
    %c0_i32 = arith.constant 0 : i32
    %c0_i32_0 = arith.constant 0 : i32
    return %arg0, %c0_i32 : i32, i32
  }
  func.func @transform_1(%arg0: i32) -> (i32, i32) {
    %c0_i32 = arith.constant 0 : i32
    %c0_i32_0 = arith.constant 0 : i32
    %c0_i32_1 = arith.constant 0 : i32
    return %c0_i32, %c0_i32_0 : i32, i32
  }
  func.func @transform_2(%arg0: i32) -> (i32, i32) {
    %c0_i32 = arith.constant 0 : i32
    %c0_i32_0 = arith.constant 0 : i32
    %c0_i32_1 = arith.constant 0 : i32
    return %c0_i32, %c0_i32_0 : i32, i32
  }
  func.func @transform_3(%arg0: i32) -> (i32, i32) {
    %c0_i32 = arith.constant 0 : i32
    %c0_i32_0 = arith.constant 0 : i32
    %c0_i32_1 = arith.constant 0 : i32
    return %c0_i32, %c0_i32_0 : i32, i32
  }
  func.func @transform_4(%arg0: i32) -> (i32, i32) {
    %c0_i32 = arith.constant 0 : i32
    %c0_i32_0 = arith.constant 0 : i32
    %c0_i32_1 = arith.constant 0 : i32
    return %c0_i32, %c0_i32_0 : i32, i32
  }
  func.func @transform_5(%arg0: i32) -> (i32, i32) {
    %c0_i32 = arith.constant 0 : i32
    %c0_i32_0 = arith.constant 0 : i32
    return %arg0, %c0_i32 : i32, i32
  }
}

</mosaic_0001>

<bundles_post_ra>
// kernel: tpu_custom_call.1
= control target key start
LH: loop header
LB: loop body
LE: loop exit
PB: predicated region body
PF: predicated region fallthrough
CT: control target
= control target key end

     0   :  { %10 = vsyncpa [#allocation3], 0  ;;  %s2225_s0 = inlined_call_operand.vmem [shape: bf16[256,16], index: 0, kind: input, shape index: {}]   ;;  %s2226_s1 = inlined_call_operand.vmem [shape: bf16[16,256], index: 1, kind: input, shape index: {}]   ;;  %s2227_s2 = inlined_call_operand.vmem [shape: bf16[128,256], index: 2, kind: input, shape index: {}]   ;;  %s2228_s3 = inlined_call_operand.hbm [shape: bf16[128,256], index: 3, kind: input, shape index: {}]   ;;  %s2229_s4 = inlined_call_operand.hbm [shape: f32[8,256], index: 4, kind: input, shape index: {}]   ;;  %s2230_s5 = inlined_call_operand.vmem [shape: f32[256,1], index: 5, kind: output, shape index: {}]  }
   0x1   :  { %11 = vsyncpa [#allocation5], 0  ;;  %s1713_s18 = smov 0  }
   0x2 LB: > { %s1414_s19 = sadd.s32 4294967295, %s1675_s18   ;;  %p1416_p0 = scmp.ge.s32.totalorder %s1675_s18, 1  ;;  %s1675_s18 = sphi %s1713_s18, %s17_s18  }
   0x3   : > { %p158_p1 = scmp.lt.s32.totalorder %s1675_s18, 3  ;;  %s1677_s20 = smov [#allocation2]  }
   0x4   : > { %s176_s21 = sshll.u32 %s1677_s20, 4  ;;  %p1727_p3 = scmp.eq.s32.totalorder %s1414_s19, 0  ;;  %s177_s21 = int_to_ptr.vmem [resolvable:$true] %s176_s21 }
   0x5   : > { %p1721_p2 = pnand %p1416_p0, %p158_p1  ;;  %s1678_s24 = smov [#allocation4]  }
   0x6   : > { %s2235_s23 = scalar_select %p1727_p3, 1, 0 }
   0x7   : > { %s2234_s22 = scalar_select %p1721_p2, 1, 0 }
   0x8   : > { %p1489_p4 = pneg %p1721_p2  ;;  %s190_s25 = sshll.u32 %s1678_s24, 4  ;;  %s1739_s25 = int_to_ptr.vmem [resolvable:$true] %s190_s25 }
   0x9   : > { %s1605_s29 = scalar_lea.hbm %s2228_s3, 2048 }
   0xa   : > { %p1735_p5 = pnand %p1727_p3, %p1489_p4  ;;  %p1606_p6 = scmp.ne.s32.totalorder %s2228_s3, %s1605_s29 }
   0xb   : > { %p1612_p10 = scmp.lt.u32.totalorder %s1605_s29, %s2228_s3 }
   0xc   : > { %p1607_p7 = pneg %p1735_p5 }
   0xe   : > { %p1608_p8 = pnand %p1607_p7, %p1606_p6 }
  0x10   : > { %p1609_p9 = pneg %p1608_p8 }
  0x12   : > { %p1614_p11 = pnand %p1612_p10, %p1609_p9 }
  0x14   : > { %1617 = shalt.err (!%p1614_p11)
}
  0x15   : > { %s1618_s9 = scalar_lea.vmem %s177_s21, 2048  ;;  %p1626_p1 = scmp.lt.s32.totalorder %s177_s21, %s177_s21 }
  0x16   : > { %p1619_p12 = scmp.ne.s32.totalorder %s177_s21, %s1618_s9  ;;  %p1627_p4 = scmp.lt.s32.totalorder %s1618_s9, %s1618_s9 }
  0x18   : > { %p1621_p13 = pnand %p1619_p12, %p1607_p7  ;;  %p1628_p3 = por %p1627_p4, %p1626_p1 }
  0x1a   : > { %p1622_p0 = pneg %p1621_p13 }
  0x1c   : > { %p1629_p2 = pnand %p1628_p3, %p1622_p0 }
  0x1e   : > { %1632 = shalt.err (!%p1629_p2)
}
  0x1f   : > { %s1679_s10 = smov 128   ;;  %s1680_s11 = smov 8  }
  0x20   : > { %1492 = dma.hbm_to_vmem [thread:$0]  (!%p1735_p5), %s2228_s3, 2048, %s177_s21, [#allocation3], %s1679_s10, %s1679_s10, %s1680_s11  }
  0x21   : > { %s1633_s16 = scalar_lea.hbm %s2229_s4, 256 }
  0x22   : > { %p1634_p6 = scmp.ne.s32.totalorder %s2229_s4, %s1633_s16  ;;  %p1640_p8 = scmp.lt.u32.totalorder %s1633_s16, %s2229_s4 }
  0x24   : > { %p1636_p2 = pnand %p1634_p6, %p1607_p7 }
  0x26   : > { %p1637_p3 = pneg %p1636_p2 }
  0x28   : > { %p1642_p9 = pnand %p1640_p8, %p1637_p3 }
  0x2a   : > { %1645 = shalt.err (!%p1642_p9)
}
  0x2b   : > { %s1646_s21 = scalar_lea.vmem %s1739_s25, 256  ;;  %p1654_p13 = scmp.lt.s32.totalorder %s1739_s25, %s1739_s25 }
  0x2c   : > { %p1647_p10 = scmp.ne.s32.totalorder %s1739_s25, %s1646_s21  ;;  %p1655_p0 = scmp.lt.s32.totalorder %s1646_s21, %s1646_s21 }
  0x2e   : > { %p1649_p11 = pnand %p1647_p10, %p1607_p7  ;;  %p1656_p1 = por %p1655_p0, %p1654_p13 }
  0x30   : > { %p1650_p12 = pneg %p1649_p11 }
  0x32   : > { %p1657_p4 = pnand %p1656_p1, %p1650_p12 }
  0x34   : > { %1660 = shalt.err (!%p1657_p4)
}
  0x35   : > { %1495 = dma.hbm_to_vmem [thread:$0]  (!%p1735_p5), %s2229_s4, 256, %s1739_s25, [#allocation5]  }
  0x36   : > { %p2237_p6 = scmp.ne.s32.totalorder %s2234_s22, 0 }
  0x37   : > { %p2238_p2 = scmp.ne.s32.totalorder (!%p2237_p6), %s2235_s23, 0 }
  0x38   : > { %212 = sbr.rel (%p2237_p6) target bundleno = 984 (0x3d8), region = 40 }
  0x3f   : > { %1666 = dma.done.wait (%p2238_p2), [#allocation3], 2048  }
  0x40   : > { %1668 = vsyncadd (%p2238_p2), [#allocation3], 4294965248 }
  0x41   : > { %1670 = dma.done.wait (%p2238_p2), [#allocation5], 256  }
  0x42   : > { %1672 = vsyncadd (%p2238_p2), [#allocation5], 4294967040  ;;  %s1423_s26 = sshll.u32 %s1414_s19, 4  ;;  %v1681_v0 = vmov 0   ;;  %v1514_v1 = vld [vmem:[%s2226_s1 + $0x4] ss:$8 sps:$4 sm:$0xff]   ;;  %v277_v39 = vlaneseq }
  0x43   : > { %392 = vmatprep.mubr.bf16.mxu0 %v1681_v0  ;;  %p245_p5 = scmp.lt.s32.totalorder %s1423_s26, 31  ;;  %432 = vmatprep.mubr.bf16.mxu1 %v1681_v0  ;;  %v1516_v2 = vld [vmem:[%s2226_s1] ss:$8 sps:$4 sm:$0xff]   ;;  %vm335_vm0 = vcmask 130048   ;;  %v1527_v7 = vld [vmem:[%s2227_s2 + $0x4] ss:$8 sps:$4 sm:$0xff]  }
  0x44   : > { %360 = vmatprep.subr.bf16.mxu0 %v1514_v1  ;;  %1479 = vmatprep.subr.bf16.mxu1 %v1514_v1  ;;  %v1525_v6 = vld [vmem:[%s2227_s2] ss:$8 sps:$4 sm:$0xff]   ;;  %v1530_v8 = vld [vmem:[%s2227_s2 + $0x14] ss:$8 sps:$4 sm:$0xff]   ;;  %v1528_v10 = vld [vmem:[%s2227_s2 + $0x10] ss:$8 sps:$4 sm:$0xff]  }
  0x45   : > { %s2240_s26 = smov (!%p245_p5, %s1423_s26), 31  ;;  %361 = vmatpush1.bf16.msra.mxu0 %v1516_v2  ;;  %1480 = vmatpush1.bf16.msra.mxu1 %v1516_v2  ;;  %v1533_v11 = vld [vmem:[%s2227_s2 + $0x24] ss:$8 sps:$4 sm:$0xff]   ;;  %v1531_v13 = vld [vmem:[%s2227_s2 + $0x20] ss:$8 sps:$4 sm:$0xff]   ;;  %v1888_v40 = vshrl.u32 %v277_v39, 7 }
  0x46   : > { %s1424_s22 = sshll.u32 %s2240_s26, 2  ;;  %617 = vmatprep.subr.bf16.mxu1 %v1527_v7  ;;  %v1536_v14 = vld [vmem:[%s2227_s2 + $0x34] ss:$8 sps:$4 sm:$0xff]   ;;  %v1534_v16 = vld [vmem:[%s2227_s2 + $0x30] ss:$8 sps:$4 sm:$0xff]   ;;  %v1891_v42 = vld [vmem:[#allocation4] sm:$0xff] }
  0x47   : > { %s1808_s6 = scalar_lea.vmem %s2225_s0, %s1424_s22  ;;  %v1539_v17 = vld [vmem:[%s2227_s2 + $0x44] ss:$8 sps:$4 sm:$0xff]   ;;  %v1537_v18 = vld [vmem:[%s2227_s2 + $0x40] ss:$8 sps:$4 sm:$0xff]   ;;  %v1542_v20 = vld [vmem:[%s2227_s2 + $0x54] ss:$8 sps:$4 sm:$0xff]  }
  0x48   : > { %v1517_v3 = vld [vmem:[%s1808_s6] sm:$0xff]   ;;  %v1518_v5 = vld [vmem:[%s1808_s6 + $0x8] sm:$0xff]   ;;  %v1519_v12 = vld [vmem:[%s1808_s6 + $0x10] sm:$0xff]   ;;  %v279_v41 = vsub.s32 0, %v1888_v40  ;;  %s1682_s20 = smov 127   ;;  %vm1319_vm1 = vcmask 7168  }
  0x49   : > { %1437 = vmatmul.mubr.msk.bf16.vlgmr.msra.gmra.mrb[0].mxu0 %vm335_vm0, %v1517_v3  ;;  %v1521_v4 = vld [vmem:[%s1808_s6 + $0x20] sm:$0xff]   ;;  %v1522_v9 = vld [vmem:[%s1808_s6 + $0x28] sm:$0xff]   ;;  %v1523_v15 = vld [vmem:[%s1808_s6 + $0x30] sm:$0xff]   ;;  %s1426_s24 = sshll.u32 %s2240_s26, 3 }
  0x4a   : > { %402 = vmatprep.mubr.bf16.mxu0 %v1681_v0  ;;  %1441 = vmatmul.mubr.msk.bf16.vlgmr.msra.gmra.mrb[0].mxu1 %vm335_vm0, %v1521_v4  ;;  %v1520_v19 = vld [vmem:[%s1808_s6 + $0x18] sm:$0xff]   ;;  %v1545_v23 = vld [vmem:[%s2227_s2 + $0x64] ss:$8 sps:$4 sm:$0xff]   ;;  %v1543_v24 = vld [vmem:[%s2227_s2 + $0x60] ss:$8 sps:$4 sm:$0xff]   ;;  %v1896_v44 = vrot.slane %v1891_v42, %v279_v41  ;;  %s2186_s21 = scalar_lea.vmem %s2230_s5, %s1426_s24 }
  0x4b   : > { %442 = vmatprep.mubr.bf16.mxu1 %v1681_v0  ;;  %618 = vmatpush1.bf16.msra.mxu1 %v1525_v6  ;;  %v1524_v21 = vld [vmem:[%s1808_s6 + $0x38] sm:$0xff]   ;;  %v1549_v27 = vld [vmem:[#allocation2] ss:$8 sps:$4 sm:$0xff]   ;;  %v1551_v28 = vld [vmem:[#allocation2 + $0x4] ss:$8 sps:$4 sm:$0xff]  }
  0x4c   : > { %619 = vmatprep.subr.bf16.mxu1 %v1530_v8  ;;  %v1540_v22 = vld [vmem:[%s2227_s2 + $0x50] ss:$8 sps:$4 sm:$0xff]   ;;  %v1548_v25 = vld [vmem:[%s2227_s2 + $0x74] ss:$8 sps:$4 sm:$0xff]   ;;  %874 = vmatprep.subr.bf16.mxu0 %v1551_v28  ;;  %v1557_v31 = vld [vmem:[#allocation2 + $0x24] ss:$8 sps:$4 sm:$0xff]  }
  0x4d   : > { %v1546_v26 = vld [vmem:[%s2227_s2 + $0x70] ss:$8 sps:$4 sm:$0xff]   ;;  %v1554_v29 = vld [vmem:[#allocation2 + $0x14] ss:$8 sps:$4 sm:$0xff]   ;;  %875 = vmatpush1.bf16.msra.mxu0 %v1549_v27  ;;  %v1555_v32 = vld [vmem:[#allocation2 + $0x20] ss:$8 sps:$4 sm:$0xff]  }
  0x4e   : > { %v1552_v30 = vld [vmem:[#allocation2 + $0x10] ss:$8 sps:$4 sm:$0xff]   ;;  %876 = vmatprep.subr.bf16.mxu0 %v1554_v29  ;;  %v1560_v33 = vld [vmem:[#allocation2 + $0x34] ss:$8 sps:$4 sm:$0xff]   ;;  %v1563_v35 = vld [vmem:[#allocation2 + $0x44] ss:$8 sps:$4 sm:$0xff]  }
  0x4f   : > { %620 = vmatpush1.bf16.msra.mxu1 %v1528_v10  ;;  %v1558_v34 = vld [vmem:[#allocation2 + $0x30] ss:$8 sps:$4 sm:$0xff]   ;;  %v1561_v36 = vld [vmem:[#allocation2 + $0x40] ss:$8 sps:$4 sm:$0xff]   ;;  %v1566_v37 = vld [vmem:[#allocation2 + $0x54] ss:$8 sps:$4 sm:$0xff]  }
  0x50   : > { %621 = vmatprep.subr.bf16.mxu1 %v1533_v11  ;;  %v1564_v38 = vld [vmem:[#allocation2 + $0x50] ss:$8 sps:$4 sm:$0xff]   ;;  %v1893_v43 = vld [vmem:[#allocation4 + $0x8] sm:$0xff] }
  0x51   : > { %1438 = vmatmul.mubr.msk.bf16.gmra.mrb[4].mxu0 %vm335_vm0, %v1518_v5  ;;  %v1899_v45 = vrot.slane %v1893_v43, %v279_v41 }
  0x52   : > { %412 = vmatprep.mubr.bf16.mxu0 %v1681_v0  ;;  %1442 = vmatmul.mubr.msk.bf16.gmra.mrb[4].mxu1 %vm335_vm0, %v1522_v9 }
  0x53   : > { %452 = vmatprep.mubr.bf16.mxu1 %v1681_v0  ;;  %622 = vmatpush1.bf16.msra.mxu1 %v1531_v13 }
  0x54   : > { %623 = vmatprep.subr.bf16.mxu1 %v1536_v14  ;;  %877 = vmatpush1.bf16.msra.mxu0 %v1552_v30 }
  0x55   : > { %878 = vmatprep.subr.bf16.mxu0 %v1557_v31 }
  0x57   : > { %624 = vmatpush1.bf16.msra.mxu1 %v1534_v16 }
  0x58   : > { %625 = vmatprep.subr.bf16.mxu1 %v1539_v17  ;;  %879 = vmatpush1.bf16.msra.mxu0 %v1555_v32 }
  0x59   : > { %1439 = vmatmul.mubr.msk.bf16.gmra.mrb[8].mxu0 %vm335_vm0, %v1519_v12  ;;  %880 = vmatprep.subr.bf16.mxu0 %v1560_v33 }
  0x5a   : > { %422 = vmatprep.mubr.bf16.mxu0 %v1681_v0  ;;  %1443 = vmatmul.mubr.msk.bf16.gmra.mrb[8].mxu1 %vm335_vm0, %v1523_v15 }
  0x5b   : > { %462 = vmatprep.mubr.bf16.mxu1 %v1681_v0  ;;  %626 = vmatpush1.bf16.msra.mxu1 %v1537_v18 }
  0x5c   : > { %627 = vmatprep.subr.bf16.mxu1 %v1542_v20  ;;  %881 = vmatpush1.bf16.msra.mxu0 %v1558_v34 }
  0x5d   : > { %882 = vmatprep.subr.bf16.mxu0 %v1563_v35 }
  0x5f   : > { %628 = vmatpush1.bf16.msra.mxu1 %v1540_v22 }
  0x60   : > { %629 = vmatprep.subr.bf16.mxu1 %v1545_v23  ;;  %883 = vmatpush1.bf16.msra.mxu0 %v1561_v36 }
  0x61   : > { %1440 = vmatmul.mubr.msk.bf16.gmra.mrb[12].mxu0 %vm335_vm0, %v1520_v19  ;;  %884 = vmatprep.subr.bf16.mxu0 %v1566_v37 }
  0x62   : > { %906 = vmatprep.mubr.bf16.mxu0 %v1681_v0  ;;  %1444 = vmatmul.mubr.msk.bf16.gmra.mrb[12].mxu1 %vm335_vm0, %v1524_v21 }
  0x63   : > { %649 = vmatprep.mubr.bf16.mxu1 %v1681_v0  ;;  %630 = vmatpush1.bf16.msra.mxu1 %v1543_v24 }
  0x64   : > { %631 = vmatprep.subr.bf16.mxu1 %v1548_v25  ;;  %885 = vmatpush1.bf16.msra.mxu0 %v1564_v38 }
  0x67   : > { %632 = vmatpush1.bf16.msra.mxu1 %v1546_v26 }
 0x11c   : > { %v394_v46 = vpop.f32.mrb[0].mxu0 }
 0x11d   : > { %v395_v47 = vadd.f32 %v394_v46, %v1896_v44  ;;  %v396_v48 = vpop.f32.mrb[1].mxu0  ;;  %v434_v51 = vpop.f32.mrb[0].mxu1 }
 0x11e   : > { %v397_v49 = vadd.f32 %v396_v48, %v1899_v45  ;;  %v398_v50 = vpop.f32.mrb[2].mxu0  ;;  %v435_v55 = vadd.f32 %v434_v51, %v1896_v44  ;;  %v436_v56 = vpop.f32.mrb[1].mxu1 }
 0x11f   : > { %v473_v52 = vmax.f32 %v395_v47, 0.0  ;;  %v399_v53 = vadd.f32 %v398_v50, %v1896_v44  ;;  %v400_v54 = vpop.f32.mrb[3].mxu0  ;;  %v437_v58 = vadd.f32 %v436_v56, %v1899_v45  ;;  %v438_v59 = vpop.f32.mrb[2].mxu1 }
 0x120   : > { %v401_v57 = vadd.f32 %v400_v54, %v1899_v45  ;;  %v481_v62 = vmax.f32 %v435_v55, 0.0  ;;  %v439_v63 = vadd.f32 %v438_v59, %v1896_v44  ;;  %v440_v1 = vpop.f32.mrb[3].mxu1 }
 0x121   : > { %v489_v60 = vadd.f32 %v473_v52, %v397_v49  ;;  %v474_v61 = vmax.f32 %v399_v53, 0.0  ;;  %v441_v2 = vadd.f32 %v440_v1, %v1899_v45 }
 0x122   : > { %v1909_v4 = vadd.f32 %v481_v62, %v437_v58  ;;  %v482_v5 = vmax.f32 %v439_v63, 0.0 }
 0x123   : > { %v490_v3 = vadd.f32 %v474_v61, %v401_v57 }
 0x124   : > { %v404_v6 = vpop.f32.mrb[4].mxu0  ;;  %v1912_v10 = vadd.f32 %v482_v5, %v441_v2 }
 0x125   : > { %v521_v7 = vpack.c.bf16 %v490_v3, %v489_v60  ;;  %v405_v8 = vadd.f32 %v404_v6, %v1896_v44  ;;  %v406_v9 = vpop.f32.mrb[5].mxu0  ;;  %v444_v13 = vpop.f32.mrb[4].mxu1 }
 0x126   : > { %v407_v11 = vadd.f32 %v406_v9, %v1899_v45  ;;  %v408_v12 = vpop.f32.mrb[6].mxu0  ;;  %v445_v17 = vadd.f32 %v444_v13, %v1896_v44  ;;  %v446_v18 = vpop.f32.mrb[5].mxu1  ;;  %v525_v19 = vpack.c.bf16 %v1912_v10, %v1909_v4  ;;  %v531_v4 = vsub.s32 1, %v1888_v40 }
 0x127   : > { %v475_v14 = vmax.f32 %v405_v8, 0.0  ;;  %v409_v15 = vadd.f32 %v408_v12, %v1896_v44  ;;  %650 = vmatmul.mubr.bf16.vlgmr.msra.gmra.mrb[16].mxu1 %v521_v7  ;;  %v410_v16 = vpop.f32.mrb[7].mxu0  ;;  %v447_v21 = vadd.f32 %v446_v18, %v1899_v45  ;;  %v448_v22 = vpop.f32.mrb[6].mxu1 }
 0x128   : > { %v411_v20 = vadd.f32 %v410_v16, %v1899_v45  ;;  %659 = vmatprep.mubr.bf16.mxu1 %v1681_v0  ;;  %v483_v25 = vmax.f32 %v445_v17, 0.0  ;;  %v449_v26 = vadd.f32 %v448_v22, %v1896_v44  ;;  %v450_v27 = vpop.f32.mrb[7].mxu1  ;;  %v1954_v10 = vrot.slane %v1891_v42, %v531_v4 }
 0x129   : > { %v491_v23 = vadd.f32 %v475_v14, %v407_v11  ;;  %v476_v24 = vmax.f32 %v409_v15, 0.0  ;;  %v451_v28 = vadd.f32 %v450_v27, %v1899_v45 }
 0x12a   : > { %v1924_v30 = vadd.f32 %v483_v25, %v447_v21  ;;  %v484_v31 = vmax.f32 %v449_v26, 0.0 }
 0x12b   : > { %v492_v29 = vadd.f32 %v476_v24, %v411_v20 }
 0x12c   : > { %v414_v32 = vpop.f32.mrb[8].mxu0  ;;  %v500_v36 = vadd.f32 %v484_v31, %v451_v28 }
 0x12d   : > { %v415_v33 = vadd.f32 %v414_v32, %v1896_v44  ;;  %v416_v34 = vpop.f32.mrb[9].mxu0  ;;  %v522_v35 = vpack.c.bf16 %v492_v29, %v491_v23  ;;  %v454_v39 = vpop.f32.mrb[8].mxu1  ;;  %v1572_v32 = vld [vmem:[#allocation2 + $0x74] ss:$8 sps:$4 sm:$0xff]  }
 0x12e   : > { %v417_v37 = vadd.f32 %v416_v34, %v1899_v45  ;;  %v418_v38 = vpop.f32.mrb[10].mxu0  ;;  %v455_v48 = vadd.f32 %v454_v39, %v1896_v44  ;;  %v456_v49 = vpop.f32.mrb[9].mxu1  ;;  %v526_v50 = vpack.c.bf16 %v500_v36, %v1924_v30 }
 0x12f   : > { %v477_v41 = vmax.f32 %v415_v33, 0.0  ;;  %v419_v46 = vadd.f32 %v418_v38, %v1896_v44  ;;  %660 = vmatmul.mubr.bf16.gmra.mrb[20].mxu1 %v522_v35  ;;  %v420_v47 = vpop.f32.mrb[11].mxu0  ;;  %v457_v52 = vadd.f32 %v456_v49, %v1899_v45  ;;  %v458_v53 = vpop.f32.mrb[10].mxu1  ;;  %v1570_v33 = vld [vmem:[#allocation2 + $0x70] ss:$8 sps:$4 sm:$0xff]  }
 0x130   : > { %v421_v51 = vadd.f32 %v420_v47, %v1899_v45  ;;  %669 = vmatprep.mubr.bf16.mxu1 %v1681_v0  ;;  %v485_v56 = vmax.f32 %v455_v48, 0.0  ;;  %v459_v57 = vadd.f32 %v458_v53, %v1896_v44  ;;  %v460_v58 = vpop.f32.mrb[11].mxu1 }
 0x131   : > { %v493_v54 = vadd.f32 %v477_v41, %v417_v37  ;;  %v478_v55 = vmax.f32 %v419_v46, 0.0  ;;  %v461_v59 = vadd.f32 %v460_v58, %v1899_v45 }
 0x132   : > { %v501_v61 = vadd.f32 %v485_v56, %v457_v52  ;;  %v486_v62 = vmax.f32 %v459_v57, 0.0 }
 0x133   : > { %v494_v60 = vadd.f32 %v478_v55, %v421_v51 }
 0x134   : > { %v424_v63 = vpop.f32.mrb[12].mxu0  ;;  %v502_v5 = vadd.f32 %v486_v62, %v461_v59 }
 0x135   : > { %v425_v1 = vadd.f32 %v424_v63, %v1896_v44  ;;  %v426_v2 = vpop.f32.mrb[13].mxu0  ;;  %v523_v3 = vpack.c.bf16 %v494_v60, %v493_v54  ;;  %v464_v8 = vpop.f32.mrb[12].mxu1 }
 0x136   : > { %v427_v6 = vadd.f32 %v426_v2, %v1899_v45  ;;  %v428_v7 = vpop.f32.mrb[14].mxu0  ;;  %v465_v13 = vadd.f32 %v464_v8, %v1896_v44  ;;  %v466_v14 = vpop.f32.mrb[13].mxu1  ;;  %v527_v15 = vpack.c.bf16 %v502_v5, %v501_v61 }
 0x137   : > { %v479_v9 = vmax.f32 %v425_v1, 0.0  ;;  %v429_v11 = vadd.f32 %v428_v7, %v1896_v44  ;;  %670 = vmatmul.mubr.bf16.gmra.mrb[24].mxu1 %v523_v3  ;;  %v430_v12 = vpop.f32.mrb[15].mxu0  ;;  %v467_v17 = vadd.f32 %v466_v14, %v1899_v45  ;;  %v468_v18 = vpop.f32.mrb[14].mxu1 }
 0x138   : > { %v431_v16 = vadd.f32 %v430_v12, %v1899_v45  ;;  %679 = vmatprep.mubr.bf16.mxu1 %v1681_v0  ;;  %v487_v22 = vmax.f32 %v465_v13, 0.0  ;;  %v469_v23 = vadd.f32 %v468_v18, %v1896_v44  ;;  %v470_v24 = vpop.f32.mrb[15].mxu1  ;;  %v1569_v44 = vld [vmem:[#allocation2 + $0x64] ss:$8 sps:$4 sm:$0xff]  }
 0x139   : > { %v495_v20 = vadd.f32 %v479_v9, %v427_v6  ;;  %v480_v21 = vmax.f32 %v429_v11, 0.0  ;;  %v471_v25 = vadd.f32 %v470_v24, %v1899_v45  ;;  %v1567_v45 = vld [vmem:[#allocation2 + $0x60] ss:$8 sps:$4 sm:$0xff]   ;;  %886 = vmatprep.subr.bf16.mxu0 %v1569_v44 }
 0x13a   : > { %v503_v27 = vadd.f32 %v487_v22, %v467_v17  ;;  %v488_v28 = vmax.f32 %v469_v23, 0.0  ;;  %887 = vmatpush1.bf16.msra.mxu0 %v1567_v45 }
 0x13b   : > { %v496_v26 = vadd.f32 %v480_v21, %v431_v16  ;;  %888 = vmatprep.subr.bf16.mxu0 %v1572_v32 }
 0x13c   : > { %v504_v30 = vadd.f32 %v488_v28, %v471_v25 }
 0x13d   : > { %v524_v29 = vpack.c.bf16 %v496_v26, %v495_v20 }
 0x13e   : > { %v528_v31 = vpack.c.bf16 %v504_v30, %v503_v27  ;;  %889 = vmatpush1.bf16.msra.mxu0 %v1570_v33 }
 0x13f   : > { %680 = vmatmul.mubr.bf16.gmra.mrb[28].mxu1 %v524_v29 }
 0x140   : > { %689 = vmatprep.mubr.bf16.mxu1 %v1681_v0 }
 0x147   : > { %690 = vmatmul.mubr.bf16.gmra.mrb[32].mxu1 %v525_v19  ;;  %v1957_v19 = vrot.slane %v1893_v43, %v531_v4 }
 0x148   : > { %699 = vmatprep.mubr.bf16.mxu1 %v1681_v0 }
 0x14f   : > { %700 = vmatmul.mubr.bf16.gmra.mrb[36].mxu1 %v526_v50 }
 0x150   : > { %709 = vmatprep.mubr.bf16.mxu1 %v1681_v0 }
 0x157   : > { %710 = vmatmul.mubr.bf16.gmra.mrb[40].mxu1 %v527_v15 }
 0x158   : > { %719 = vmatprep.mubr.bf16.mxu1 %v1681_v0 }
 0x15f   : > { %720 = vmatmul.mubr.bf16.gmra.mrb[44].mxu1 %v528_v31 }
 0x1fa   : > { %v651_v34 = vpop.f32.mrb[16].mxu1 }
 0x1fb   : > { %v652_v35 = vadd.f32 %v651_v34, %v1954_v10  ;;  %v653_v36 = vpop.f32.mrb[17].mxu1 }
 0x1fc   : > { %v654_v37 = vadd.f32 %v653_v36, %v1957_v19  ;;  %v655_v38 = vpop.f32.mrb[18].mxu1 }
 0x1fd   : > { %v730_v39 = vmax.f32 %v652_v35, 0.0  ;;  %v656_v41 = vadd.f32 %v655_v38, %v1954_v10  ;;  %v657_v46 = vpop.f32.mrb[19].mxu1 }
 0x1fe   : > { %v658_v47 = vadd.f32 %v657_v46, %v1957_v19 }
 0x1ff   : > { %v746_v48 = vadd.f32 %v730_v39, %v654_v37  ;;  %v731_v49 = vmax.f32 %v656_v41, 0.0 }
 0x201   : > { %v747_v50 = vadd.f32 %v731_v49, %v658_v47 }
 0x202   : > { %v661_v51 = vpop.f32.mrb[20].mxu1 }
 0x203   : > { %v778_v52 = vpack.c.bf16 %v747_v50, %v746_v48  ;;  %v662_v53 = vadd.f32 %v661_v51, %v1954_v10  ;;  %v663_v54 = vpop.f32.mrb[21].mxu1 }
 0x204   : > { %v664_v55 = vadd.f32 %v663_v54, %v1957_v19  ;;  %v665_v56 = vpop.f32.mrb[22].mxu1 }
 0x205   : > { %v732_v57 = vmax.f32 %v662_v53, 0.0  ;;  %v666_v58 = vadd.f32 %v665_v56, %v1954_v10  ;;  %v667_v59 = vpop.f32.mrb[23].mxu1  ;;  %907 = vmatmul.mubr.bf16.vlgmr.msra.gmra.mrb[16].mxu0 %v778_v52 }
 0x206   : > { %v668_v60 = vadd.f32 %v667_v59, %v1957_v19  ;;  %916 = vmatprep.mubr.bf16.mxu0 %v1681_v0 }
 0x207   : > { %v748_v61 = vadd.f32 %v732_v57, %v664_v55  ;;  %v733_v62 = vmax.f32 %v666_v58, 0.0 }
 0x209   : > { %v749_v63 = vadd.f32 %v733_v62, %v668_v60 }
 0x20a   : > { %v671_v1 = vpop.f32.mrb[24].mxu1 }
 0x20b   : > { %v672_v2 = vadd.f32 %v671_v1, %v1954_v10  ;;  %v673_v3 = vpop.f32.mrb[25].mxu1  ;;  %v779_v5 = vpack.c.bf16 %v749_v63, %v748_v61 }
 0x20c   : > { %v674_v6 = vadd.f32 %v673_v3, %v1957_v19  ;;  %v675_v7 = vpop.f32.mrb[26].mxu1 }
 0x20d   : > { %v734_v8 = vmax.f32 %v672_v2, 0.0  ;;  %v676_v9 = vadd.f32 %v675_v7, %v1954_v10  ;;  %917 = vmatmul.mubr.bf16.gmra.mrb[20].mxu0 %v779_v5  ;;  %v677_v11 = vpop.f32.mrb[27].mxu1 }
 0x20e   : > { %v678_v12 = vadd.f32 %v677_v11, %v1957_v19  ;;  %926 = vmatprep.mubr.bf16.mxu0 %v1681_v0 }
 0x20f   : > { %v750_v13 = vadd.f32 %v734_v8, %v674_v6  ;;  %v735_v14 = vmax.f32 %v676_v9, 0.0 }
 0x211   : > { %v751_v15 = vadd.f32 %v735_v14, %v678_v12 }
 0x212   : > { %v681_v16 = vpop.f32.mrb[28].mxu1 }
 0x213   : > { %v682_v17 = vadd.f32 %v681_v16, %v1954_v10  ;;  %v683_v18 = vpop.f32.mrb[29].mxu1  ;;  %v780_v20 = vpack.c.bf16 %v751_v15, %v750_v13 }
 0x214   : > { %v684_v21 = vadd.f32 %v683_v18, %v1957_v19  ;;  %v685_v22 = vpop.f32.mrb[30].mxu1 }
 0x215   : > { %v736_v23 = vmax.f32 %v682_v17, 0.0  ;;  %v686_v24 = vadd.f32 %v685_v22, %v1954_v10  ;;  %927 = vmatmul.mubr.bf16.gmra.mrb[24].mxu0 %v780_v20  ;;  %v687_v25 = vpop.f32.mrb[31].mxu1 }
 0x216   : > { %v688_v26 = vadd.f32 %v687_v25, %v1957_v19  ;;  %936 = vmatprep.mubr.bf16.mxu0 %v1681_v0  ;;  %v788_v25 = vsub.s32 2, %v1888_v40 }
 0x217   : > { %v752_v27 = vadd.f32 %v736_v23, %v684_v21  ;;  %v737_v28 = vmax.f32 %v686_v24, 0.0 }
 0x219   : > { %v753_v29 = vadd.f32 %v737_v28, %v688_v26  ;;  %v2000_v26 = vrot.slane %v1891_v42, %v788_v25 }
 0x21a   : > { %v691_v30 = vpop.f32.mrb[32].mxu1 }
 0x21b   : > { %v781_v31 = vpack.c.bf16 %v753_v29, %v752_v27  ;;  %v692_v44 = vadd.f32 %v691_v30, %v1954_v10  ;;  %v693_v45 = vpop.f32.mrb[33].mxu1  ;;  %v2003_v27 = vrot.slane %v1893_v43, %v788_v25  ;;  %v1165_v43 = vsub.s32 3, %v1888_v40 }
 0x21c   : > { %v694_v32 = vadd.f32 %v693_v45, %v1957_v19  ;;  %v695_v33 = vpop.f32.mrb[34].mxu1 }
 0x21d   : > { %937 = vmatmul.mubr.bf16.gmra.mrb[28].mxu0 %v781_v31  ;;  %v738_v4 = vmax.f32 %v692_v44, 0.0  ;;  %v696_v34 = vadd.f32 %v695_v33, %v1954_v10  ;;  %v697_v35 = vpop.f32.mrb[35].mxu1 }
 0x21e   : > { %v698_v36 = vadd.f32 %v697_v35, %v1957_v19  ;;  %946 = vmatprep.mubr.bf16.mxu0 %v1681_v0 }
 0x21f   : > { %v754_v37 = vadd.f32 %v738_v4, %v694_v32  ;;  %v739_v38 = vmax.f32 %v696_v34, 0.0 }
 0x221   : > { %v755_v39 = vadd.f32 %v739_v38, %v698_v36 }
 0x222   : > { %v701_v41 = vpop.f32.mrb[36].mxu1 }
 0x223   : > { %v702_v46 = vadd.f32 %v701_v41, %v1954_v10  ;;  %v703_v47 = vpop.f32.mrb[37].mxu1  ;;  %v782_v48 = vpack.c.bf16 %v755_v39, %v754_v37 }
 0x224   : > { %v704_v49 = vadd.f32 %v703_v47, %v1957_v19  ;;  %v705_v50 = vpop.f32.mrb[38].mxu1 }
 0x225   : > { %v740_v51 = vmax.f32 %v702_v46, 0.0  ;;  %v706_v52 = vadd.f32 %v705_v50, %v1954_v10  ;;  %947 = vmatmul.mubr.bf16.gmra.mrb[32].mxu0 %v782_v48  ;;  %v707_v53 = vpop.f32.mrb[39].mxu1  ;;  %v2014_v48 = vrot.slane %v1891_v42, %v1165_v43 }
 0x226   : > { %v708_v54 = vadd.f32 %v707_v53, %v1957_v19  ;;  %956 = vmatprep.mubr.bf16.mxu0 %v1681_v0 }
 0x227   : > { %v756_v55 = vadd.f32 %v740_v51, %v704_v49  ;;  %v741_v56 = vmax.f32 %v706_v52, 0.0 }
 0x229   : > { %v757_v57 = vadd.f32 %v741_v56, %v708_v54 }
 0x22a   : > { %v711_v58 = vpop.f32.mrb[40].mxu1 }
 0x22b   : > { %v712_v59 = vadd.f32 %v711_v58, %v1954_v10  ;;  %v713_v60 = vpop.f32.mrb[41].mxu1  ;;  %v783_v61 = vpack.c.bf16 %v757_v57, %v756_v55 }
 0x22c   : > { %v714_v62 = vadd.f32 %v713_v60, %v1957_v19  ;;  %v715_v63 = vpop.f32.mrb[42].mxu1 }
 0x22d   : > { %v742_v1 = vmax.f32 %v712_v59, 0.0  ;;  %v716_v2 = vadd.f32 %v715_v63, %v1954_v10  ;;  %957 = vmatmul.mubr.bf16.gmra.mrb[36].mxu0 %v783_v61  ;;  %v717_v3 = vpop.f32.mrb[43].mxu1 }
 0x22e   : > { %v718_v5 = vadd.f32 %v717_v3, %v1957_v19  ;;  %966 = vmatprep.mubr.bf16.mxu0 %v1681_v0 }
 0x22f   : > { %v758_v6 = vadd.f32 %v742_v1, %v714_v62  ;;  %v743_v7 = vmax.f32 %v716_v2, 0.0 }
 0x231   : > { %v759_v8 = vadd.f32 %v743_v7, %v718_v5 }
 0x232   : > { %v721_v9 = vpop.f32.mrb[44].mxu1 }
 0x233   : > { %v722_v11 = vadd.f32 %v721_v9, %v1954_v10  ;;  %v723_v12 = vpop.f32.mrb[45].mxu1  ;;  %v784_v13 = vpack.c.bf16 %v759_v8, %v758_v6 }
 0x234   : > { %v724_v14 = vadd.f32 %v723_v12, %v1957_v19  ;;  %v725_v15 = vpop.f32.mrb[46].mxu1 }
 0x235   : > { %v744_v16 = vmax.f32 %v722_v11, 0.0  ;;  %v726_v17 = vadd.f32 %v725_v15, %v1954_v10  ;;  %967 = vmatmul.mubr.bf16.gmra.mrb[40].mxu0 %v784_v13  ;;  %v727_v18 = vpop.f32.mrb[47].mxu1 }
 0x236   : > { %v728_v20 = vadd.f32 %v727_v18, %v1957_v19  ;;  %976 = vmatprep.mubr.bf16.mxu0 %v1681_v0 }
 0x237   : > { %v760_v21 = vadd.f32 %v744_v16, %v724_v14  ;;  %v745_v22 = vmax.f32 %v726_v17, 0.0 }
 0x239   : > { %v761_v23 = vadd.f32 %v745_v22, %v728_v20 }
 0x23b   : > { %v785_v24 = vpack.c.bf16 %v761_v23, %v760_v21 }
 0x23d   : > { %977 = vmatmul.mubr.bf16.gmra.mrb[44].mxu0 %v785_v24 }
 0x2d8   : > { %v908_v10 = vpop.f32.mrb[16].mxu0 }
 0x2d9   : > { %v909_v28 = vadd.f32 %v908_v10, %v2000_v26  ;;  %v910_v29 = vpop.f32.mrb[17].mxu0 }
 0x2da   : > { %v911_v19 = vadd.f32 %v910_v29, %v2003_v27  ;;  %v912_v0 = vpop.f32.mrb[18].mxu0 }
 0x2db   : > { %v987_v30 = vmax.f32 %v909_v28, 0.0  ;;  %v913_v31 = vadd.f32 %v912_v0, %v2000_v26  ;;  %v914_v44 = vpop.f32.mrb[19].mxu0 }
 0x2dc   : > { %v915_v45 = vadd.f32 %v914_v44, %v2003_v27 }
 0x2dd   : > { %v1003_v32 = vadd.f32 %v987_v30, %v911_v19  ;;  %v988_v33 = vmax.f32 %v913_v31, 0.0 }
 0x2df   : > { %v1004_v4 = vadd.f32 %v988_v33, %v915_v45  ;;  %1019 = vadd.xlane.f32.xlu0 %v1003_v32  ;;  %v1067_v53 = vmul.f32 %v1003_v32, %v1003_v32  ;;  %v1167_v58 = vmul.f32 %v2014_v48, %v1003_v32 }
 0x2e0   : > { %v918_v34 = vpop.f32.mrb[20].mxu0 }
 0x2e1   : > { %v919_v35 = vadd.f32 %v918_v34, %v2000_v26  ;;  %v920_v36 = vpop.f32.mrb[21].mxu0  ;;  %v1068_v37 = vmul.f32 %v1004_v4, %v1004_v4  ;;  %v1168_v52 = vmul.f32 %v2014_v48, %v1004_v4 }
 0x2e2   : > { %v921_v38 = vadd.f32 %v920_v36, %v2003_v27  ;;  %v922_v39 = vpop.f32.mrb[22].mxu0 }
 0x2e3   : > { %v989_v41 = vmax.f32 %v919_v35, 0.0  ;;  %v923_v46 = vadd.f32 %v922_v39, %v2000_v26  ;;  %v924_v47 = vpop.f32.mrb[23].mxu0  ;;  %1085 = vadd.xlane.f32.xlu1 %v1068_v37  ;;  %1021 = vadd.xlane.f32.xlu0 %v1004_v4 }
 0x2e4   : > { %v925_v49 = vadd.f32 %v924_v47, %v2003_v27 }
 0x2e5   : > { %v1005_v50 = vadd.f32 %v989_v41, %v921_v38  ;;  %v990_v51 = vmax.f32 %v923_v46, 0.0 }
 0x2e7   : > { %v1006_v54 = vadd.f32 %v990_v51, %v925_v49  ;;  %1185 = vadd.xlane.f32.xlu1 %v1168_v52  ;;  %1083 = vadd.xlane.f32.xlu0 %v1067_v53  ;;  %v1069_v5 = vmul.f32 %v1005_v50, %v1005_v50  ;;  %v1169_v12 = vmul.f32 %v2014_v48, %v1005_v50 }
 0x2e8   : > { %v928_v55 = vpop.f32.mrb[24].mxu0 }
 0x2e9   : > { %v929_v56 = vadd.f32 %v928_v55, %v2000_v26  ;;  %v930_v57 = vpop.f32.mrb[25].mxu0  ;;  %v1070_v11 = vmul.f32 %v1006_v54, %v1006_v54  ;;  %v1170_v22 = vmul.f32 %v2014_v48, %v1006_v54 }
 0x2ea   : > { %v931_v59 = vadd.f32 %v930_v57, %v2003_v27  ;;  %v932_v60 = vpop.f32.mrb[26].mxu0 }
 0x2eb   : > { %v991_v61 = vmax.f32 %v929_v56, 0.0  ;;  %v933_v62 = vadd.f32 %v932_v60, %v2000_v26  ;;  %v934_v63 = vpop.f32.mrb[27].mxu0  ;;  %1023 = vadd.xlane.f32.xlu1 %v1005_v50  ;;  %1183 = vadd.xlane.f32.xlu0 %v1167_v58 }
 0x2ec   : > { %v935_v1 = vadd.f32 %v934_v63, %v2003_v27 }
 0x2ed   : > { %v1007_v2 = vadd.f32 %v991_v61, %v931_v59  ;;  %v992_v3 = vmax.f32 %v933_v62, 0.0 }
 0x2ef   : > { %v1008_v6 = vadd.f32 %v992_v3, %v935_v1  ;;  %1025 = vadd.xlane.f32.xlu1 %v1006_v54  ;;  %1087 = vadd.xlane.f32.xlu0 %v1069_v5  ;;  %v1071_v25 = vmul.f32 %v1007_v2, %v1007_v2  ;;  %v1171_v4 = vmul.f32 %v2014_v48, %v1007_v2 }
 0x2f0   : > { %v938_v7 = vpop.f32.mrb[28].mxu0 }
 0x2f1   : > { %v939_v8 = vadd.f32 %v938_v7, %v2000_v26  ;;  %v940_v9 = vpop.f32.mrb[29].mxu0  ;;  %v1072_v33 = vmul.f32 %v1008_v6, %v1008_v6  ;;  %v1172_v35 = vmul.f32 %v2014_v48, %v1008_v6 }
 0x2f2   : > { %v941_v13 = vadd.f32 %v940_v9, %v2003_v27  ;;  %v942_v14 = vpop.f32.mrb[30].mxu0 }
 0x2f3   : > { %v993_v15 = vmax.f32 %v939_v8, 0.0  ;;  %v943_v16 = vadd.f32 %v942_v14, %v2000_v26  ;;  %1089 = vadd.xlane.f32.xlu1 %v1070_v11  ;;  %1187 = vadd.xlane.f32.xlu0 %v1169_v12  ;;  %v944_v17 = vpop.f32.mrb[31].mxu0 }
 0x2f4   : > { %v945_v18 = vadd.f32 %v944_v17, %v2003_v27 }
 0x2f5   : > { %v1009_v20 = vadd.f32 %v993_v15, %v941_v13  ;;  %v994_v21 = vmax.f32 %v943_v16, 0.0 }
 0x2f7   : > { %v1010_v23 = vadd.f32 %v994_v21, %v945_v18  ;;  %1189 = vadd.xlane.f32.xlu1 %v1170_v22  ;;  %1027 = vadd.xlane.f32.xlu0 %v1007_v2  ;;  %v1073_v52 = vmul.f32 %v1009_v20, %v1009_v20  ;;  %v1173_v58 = vmul.f32 %v2014_v48, %v1009_v20 }
 0x2f8   : > { %v948_v24 = vpop.f32.mrb[32].mxu0 }
 0x2f9   : > { %v949_v10 = vadd.f32 %v948_v24, %v2000_v26  ;;  %v950_v28 = vpop.f32.mrb[33].mxu0  ;;  %v1074_v57 = vmul.f32 %v1010_v23, %v1010_v23  ;;  %v1174_v7 = vmul.f32 %v2014_v48, %v1010_v23 }
 0x2fa   : > { %v951_v29 = vadd.f32 %v950_v28, %v2003_v27  ;;  %v952_v19 = vpop.f32.mrb[34].mxu0 }
 0x2fb   : > { %1029 = vadd.xlane.f32.xlu1 %v1008_v6  ;;  %1091 = vadd.xlane.f32.xlu0 %v1071_v25  ;;  %v995_v0 = vmax.f32 %v949_v10, 0.0  ;;  %v953_v30 = vadd.f32 %v952_v19, %v2000_v26  ;;  %v954_v31 = vpop.f32.mrb[35].mxu0 }
 0x2fc   : > { %v955_v44 = vadd.f32 %v954_v31, %v2003_v27 }
 0x2fd   : > { %v2033_v45 = vadd.f32 %v995_v0, %v951_v29  ;;  %v996_v32 = vmax.f32 %v953_v30, 0.0 }
 0x2ff   : > { %1093 = vadd.xlane.f32.xlu1 %v1072_v33  ;;  %1191 = vadd.xlane.f32.xlu0 %v1171_v4  ;;  %v1012_v43 = vadd.f32 %v996_v32, %v955_v44  ;;  %v1075_v13 = vmul.f32 %v2033_v45, %v2033_v45  ;;  %v1175_v10 = vmul.f32 %v2014_v48, %v2033_v45 }
 0x300   : > { %v958_v34 = vpop.f32.mrb[36].mxu0 }
 0x301   : > { %v959_v36 = vadd.f32 %v958_v34, %v2000_v26  ;;  %v960_v37 = vpop.f32.mrb[37].mxu0  ;;  %v2039_v38 = vmul.f32 %v2014_v48, %v1012_v43  ;;  %v1076_v25 = vmul.f32 %v1012_v43, %v1012_v43 }
 0x302   : > { %v961_v39 = vadd.f32 %v960_v37, %v2003_v27  ;;  %v962_v41 = vpop.f32.mrb[38].mxu0 }
 0x303   : > { %1193 = vadd.xlane.f32.xlu1 %v1172_v35  ;;  %1031 = vadd.xlane.f32.xlu0 %v1009_v20  ;;  %v997_v46 = vmax.f32 %v959_v36, 0.0  ;;  %v963_v47 = vadd.f32 %v962_v41, %v2000_v26  ;;  %v964_v49 = vpop.f32.mrb[39].mxu0 }
 0x304   : > { %v965_v50 = vadd.f32 %v964_v49, %v2003_v27 }
 0x305   : > { %v1013_v51 = vadd.f32 %v997_v46, %v961_v39  ;;  %v998_v53 = vmax.f32 %v963_v47, 0.0 }
 0x307   : > { %1033 = vadd.xlane.f32.xlu1 %v1010_v23  ;;  %1095 = vadd.xlane.f32.xlu0 %v1073_v52  ;;  %v1014_v54 = vadd.f32 %v998_v53, %v965_v50  ;;  %v1177_v55 = vmul.f32 %v2014_v48, %v1013_v51 }
 0x308   : > { %v968_v56 = vpop.f32.mrb[40].mxu0 }
 0x309   : > { %v969_v59 = vadd.f32 %v968_v56, %v2000_v26  ;;  %v970_v60 = vpop.f32.mrb[41].mxu0  ;;  %v1178_v61 = vmul.f32 %v2014_v48, %v1014_v54  ;;  %v1078_v30 = vmul.f32 %v1014_v54, %v1014_v54 }
 0x30a   : > { %v971_v62 = vadd.f32 %v970_v60, %v2003_v27  ;;  %v972_v63 = vpop.f32.mrb[42].mxu0 }
 0x30b   : > { %1097 = vadd.xlane.f32.xlu1 %v1074_v57  ;;  %1195 = vadd.xlane.f32.xlu0 %v1173_v58  ;;  %v999_v1 = vmax.f32 %v969_v59, 0.0  ;;  %v973_v2 = vadd.f32 %v972_v63, %v2000_v26  ;;  %v974_v3 = vpop.f32.mrb[43].mxu0 }
 0x30c   : > { %v975_v5 = vadd.f32 %v974_v3, %v2003_v27 }
 0x30d   : > { %v1015_v6 = vadd.f32 %v999_v1, %v971_v62  ;;  %v1000_v8 = vmax.f32 %v973_v2, 0.0 }
 0x30f   : > { %1197 = vadd.xlane.f32.xlu1 %v1174_v7  ;;  %1035 = vadd.xlane.f32.xlu0 %v2033_v45  ;;  %v1016_v9 = vadd.f32 %v1000_v8, %v975_v5  ;;  %v1179_v11 = vmul.f32 %v2014_v48, %v1015_v6  ;;  %v1079_v31 = vmul.f32 %v1015_v6, %v1015_v6 }
 0x310   : > { %v978_v12 = vpop.f32.mrb[44].mxu0 }
 0x311   : > { %v979_v14 = vadd.f32 %v978_v12, %v2000_v26  ;;  %v980_v15 = vpop.f32.mrb[45].mxu0  ;;  %v1180_v16 = vmul.f32 %v2014_v48, %v1016_v9 }
 0x312   : > { %v981_v17 = vadd.f32 %v980_v15, %v2003_v27  ;;  %v982_v18 = vpop.f32.mrb[46].mxu0 }
 0x313   : > { %1037 = vadd.xlane.f32.xlu1 %v1012_v43  ;;  %1099 = vadd.xlane.f32.xlu0 %v1075_v13  ;;  %v1001_v20 = vmax.f32 %v979_v14, 0.0  ;;  %v983_v21 = vadd.f32 %v982_v18, %v2000_v26  ;;  %v984_v22 = vpop.f32.mrb[47].mxu0  ;;  %v1077_v26 = vmul.f32 %v1013_v51, %v1013_v51 }
 0x314   : > { %v985_v23 = vadd.f32 %v984_v22, %v2003_v27  ;;  %v1080_v27 = vmul.f32 %v1016_v9, %v1016_v9 }
 0x315   : > { %v1017_v24 = vadd.f32 %v1001_v20, %v981_v17  ;;  %v1002_v28 = vmax.f32 %v983_v21, 0.0 }
 0x317   : > { %1101 = vadd.xlane.f32.xlu1 %v1076_v25  ;;  %1199 = vadd.xlane.f32.xlu0 %v1175_v10  ;;  %v1018_v29 = vadd.f32 %v1002_v28, %v985_v23  ;;  %v1181_v19 = vmul.f32 %v2014_v48, %v1017_v24  ;;  %v1081_v45 = vmul.f32 %v1017_v24, %v1017_v24 }
 0x319   : > { %v1182_v0 = vmul.f32 %v2014_v48, %v1018_v29  ;;  %v1082_v44 = vmul.f32 %v1018_v29, %v1018_v29  ;;  %v1249_v48 = vsub.s32 4, %v1888_v40 }
 0x31b   : > { %1041 = vadd.xlane.f32.xlu1 %v1014_v54  ;;  %1039 = vadd.xlane.f32.xlu0 %v1013_v51  ;;  %v2068_v32 = vrot.slane %v1891_v42, %v1249_v48 }
 0x31f   : > { %1105 = vadd.xlane.f32.xlu1 %v1078_v30  ;;  %1103 = vadd.xlane.f32.xlu0 %v1077_v26 }
 0x323   : > { %1045 = vadd.xlane.f32.xlu1 %v1016_v9  ;;  %1043 = vadd.xlane.f32.xlu0 %v1015_v6 }
 0x327   : > { %1109 = vadd.xlane.f32.xlu1 %v1080_v27  ;;  %1107 = vadd.xlane.f32.xlu0 %v1079_v31 }
 0x32b   : > { %1049 = vadd.xlane.f32.xlu1 %v1018_v29  ;;  %1047 = vadd.xlane.f32.xlu0 %v1017_v24 }
 0x32f   : > { %1113 = vadd.xlane.f32.xlu1 %v1082_v44  ;;  %1111 = vadd.xlane.f32.xlu0 %v1081_v45 }
 0x333   : > { %1201 = vadd.xlane.f32.xlu1 %v2039_v38  ;;  %1203 = vadd.xlane.f32.xlu0 %v1177_v55 }
 0x337   : > { %1205 = vadd.xlane.f32.xlu1 %v1178_v61  ;;  %1207 = vadd.xlane.f32.xlu0 %v1179_v11 }
 0x33b   : > { %1209 = vadd.xlane.f32.xlu1 %v1180_v16  ;;  %1211 = vadd.xlane.f32.xlu0 %v1181_v19 }
 0x33f   : > { %1213 = vadd.xlane.f32.xlu1 %v1182_v0 }
 0x351   : > { %1300 = vrot.lane.b32.xlu0 %v2068_v32, %s1682_s20 }
 0x36c   : > { %v1020_v33 = vpop.xlane.xlu0 %1019 }
 0x36d   : > { %v1051_v34 = vmul.f32 0.03125, %v1020_v33 }
 0x36f   : > { %v1131_v46 = vmul.f32 %v1051_v34, %v1051_v34  ;;  %v1251_v51 = vmul.f32 %v2068_v32, %v1051_v34 }
 0x370   : > { %v1086_v4 = vpop.xlane.xlu1 %1085  ;;  %v1022_v43 = vpop.xlane.xlu0 %1021 }
 0x371   : > { %v1052_v35 = vmul.f32 0.03125, %v1022_v43  ;;  %v1116_v36 = vmul.f32 0.03125, %v1086_v4 }
 0x373   : > { %v1132_v37 = vmul.f32 %v1052_v35, %v1052_v35  ;;  %v1252_v38 = vmul.f32 %v2068_v32, %v1052_v35 }
 0x374   : > { %v1186_v39 = vpop.xlane.xlu1 %1185  ;;  %v1084_v41 = vpop.xlane.xlu0 %1083 }
 0x375   : > { %v1148_v47 = vsub.f32 %v1116_v36, %v1132_v37  ;;  %v1268_v40 = vsub.f32 %v1186_v39, %v1252_v38  ;;  %v1115_v49 = vmul.f32 0.03125, %v1084_v41 }
 0x377   : > { %v1216_v42 = vadd.f32 1e-05, %v1148_v47  ;;  %v1147_v50 = vsub.f32 %v1115_v49, %v1131_v46 }
 0x378   : > { %v1024_v52 = vpop.xlane.xlu1 %1023  ;;  %v1184_v53 = vpop.xlane.xlu0 %1183 }
 0x379   : > { %1573 = vrsqrt.f32 %v1216_v42  ;;  %v1215_v54 = vadd.f32 1e-05, %v1147_v50  ;;  %v1267_v55 = vsub.f32 %v1184_v53, %v1251_v51  ;;  %v2089_v20 = vmul.f32 0.03125, %v1024_v52 }
 0x37b   : > { %1575 = vrsqrt.f32 %v1215_v54  ;;  %v1133_v25 = vmul.f32 %v2089_v20, %v2089_v20 }
 0x37c   : > { %v1026_v56 = vpop.xlane.xlu1 %1025  ;;  %v1088_v57 = vpop.xlane.xlu0 %1087 }
 0x37d   : > { %v2091_v21 = vmul.f32 0.03125, %v1026_v56  ;;  %v1117_v22 = vmul.f32 0.03125, %v1088_v57 }
 0x37f   : > { %v1134_v28 = vmul.f32 %v2091_v21, %v2091_v21  ;;  %v1149_v29 = vsub.f32 %v1117_v22, %v1133_v25 }
 0x380   : > { %v1090_v58 = vpop.xlane.xlu1 %1089  ;;  %v2073_v59 = vpop.xlane.xlu0 %1187 }
 0x381   : > { %v1118_v10 = vmul.f32 0.03125, %v1090_v58  ;;  %v1217_v48 = vadd.f32 1e-05, %v1149_v29 }
 0x383   : > { %v1574_v60 = vpop.eup %1573  ;;  %v1150_v26 = vsub.f32 %v1118_v10, %v1134_v28  ;;  %1577 = vrsqrt.f32 %v1217_v48 }
 0x384   : > { %v2075_v61 = vmul.f32 %v1574_v60, %v1268_v40  ;;  %v2077_v62 = vpop.xlane.xlu1 %1189  ;;  %v1028_v63 = vpop.xlane.xlu0 %1027 }
 0x385   : > { %v1576_v1 = vpop.eup %1575  ;;  %v2099_v30 = vmul.f32 0.03125, %v1028_v63  ;;  %v1218_v38 = vadd.f32 1e-05, %v1150_v26 }
 0x386   : > { %v2079_v2 = vmul.f32 %v1576_v1, %v1267_v55 }
 0x387   : > { %v1135_v34 = vmul.f32 %v2099_v30, %v2099_v30  ;;  %1579 = vrsqrt.f32 %v1218_v38 }
 0x388   : > { %v1030_v3 = vpop.xlane.xlu1 %1029  ;;  %v1092_v5 = vpop.xlane.xlu0 %1091 }
 0x389   : > { %v2101_v27 = vmul.f32 0.03125, %v1030_v3  ;;  %v1119_v31 = vmul.f32 0.03125, %v1092_v5 }
 0x38b   : > { %v1136_v39 = vmul.f32 %v2101_v27, %v2101_v27  ;;  %v1151_v46 = vsub.f32 %v1119_v31, %v1135_v34 }
 0x38c   : > { %v1094_v6 = vpop.xlane.xlu1 %1093  ;;  %v2081_v7 = vpop.xlane.xlu0 %1191 }
 0x38d   : > { %v1120_v33 = vmul.f32 0.03125, %v1094_v6  ;;  %v1219_v3 = vadd.f32 1e-05, %v1151_v46 }
 0x38f   : > { %v1152_v42 = vsub.f32 %v1120_v33, %v1136_v39  ;;  %1581 = vrsqrt.f32 %v1219_v3  ;;  %v1253_v3 = vmul.f32 %v2068_v32, %v2089_v20 }
 0x390   : > { %v2083_v8 = vpop.xlane.xlu1 %1193  ;;  %v1032_v9 = vpop.xlane.xlu0 %1031 }
 0x391   : > { %v2103_v44 = vmul.f32 0.03125, %v1032_v9  ;;  %v1220_v6 = vadd.f32 1e-05, %v1152_v42 }
 0x393   : > { %v1137_v47 = vmul.f32 %v2103_v44, %v2103_v44  ;;  %1583 = vrsqrt.f32 %v1220_v6 }
 0x394   : > { %v1034_v11 = vpop.xlane.xlu1 %1033  ;;  %v1096_v12 = vpop.xlane.xlu0 %1095 }
 0x395   : > { %v2105_v45 = vmul.f32 0.03125, %v1034_v11  ;;  %v1121_v35 = vmul.f32 0.03125, %v1096_v12 }
 0x397   : > { %v1138_v40 = vmul.f32 %v2105_v45, %v2105_v45  ;;  %v1153_v54 = vsub.f32 %v1121_v35, %v1137_v47  ;;  %v1578_v35 = vpop.eup %1577 }
 0x398   : > { %v1098_v13 = vpop.xlane.xlu1 %1097  ;;  %v2085_v14 = vpop.xlane.xlu0 %1195 }
 0x399   : > { %v1122_v36 = vmul.f32 0.03125, %v1098_v13 }
 0x39b   : > { %v1154_v55 = vsub.f32 %v1122_v36, %v1138_v40 }
 0x39c   : > { %v2087_v15 = vpop.xlane.xlu1 %1197  ;;  %v1036_v16 = vpop.xlane.xlu0 %1035 }
 0x39d   : > { %v2109_v37 = vmul.f32 0.03125, %v1036_v16  ;;  %v1222_v25 = vadd.f32 1e-05, %v1154_v55 }
 0x39f   : > { %v1139_v56 = vmul.f32 %v2109_v37, %v2109_v37 }
 0x3a0   : > { %v1038_v17 = vpop.xlane.xlu1 %1037  ;;  %v1100_v18 = vpop.xlane.xlu0 %1099 }
 0x3a1   : > { %v2113_v41 = vmul.f32 0.03125, %v1038_v17  ;;  %v1123_v49 = vmul.f32 0.03125, %v1100_v18  ;;  %v1221_v17 = vadd.f32 1e-05, %v1153_v54 }
 0x3a3   : > { %v1140_v58 = vmul.f32 %v2113_v41, %v2113_v41  ;;  %v1155_v5 = vsub.f32 %v1123_v49, %v1139_v56  ;;  %1585 = vrsqrt.f32 %v1221_v17  ;;  %v1580_v49 = vpop.eup %1579  ;;  %v1256_v17 = vmul.f32 %v2068_v32, %v2101_v27 }
 0x3a4   : > { %v1102_v23 = vpop.xlane.xlu1 %1101  ;;  %v2093_v24 = vpop.xlane.xlu0 %1199  ;;  %1587 = vrsqrt.f32 %v1222_v25 }
 0x3a5   : > { %v1124_v50 = vmul.f32 0.03125, %v1102_v23 }
 0x3a7   : > { %v1156_v9 = vsub.f32 %v1124_v50, %v1140_v58 }
 0x3a8   : > { %v1042_v19 = vpop.xlane.xlu1 %1041  ;;  %v1040_v0 = vpop.xlane.xlu0 %1039 }
 0x3a9   : > { %v2119_v51 = vmul.f32 0.03125, %v1042_v19  ;;  %v2127_v60 = vmul.f32 0.03125, %v1040_v0  ;;  %v1223_v19 = vadd.f32 1e-05, %v1155_v5  ;;  %v1224_v26 = vadd.f32 1e-05, %v1156_v9 }
 0x3ab   : > { %v1142_v11 = vmul.f32 %v2119_v51, %v2119_v51  ;;  %v1141_v10 = vmul.f32 %v2127_v60, %v2127_v60  ;;  %1589 = vrsqrt.f32 %v1223_v19  ;;  %v1261_v27 = vmul.f32 %v2068_v32, %v2127_v60 }
 0x3ac   : > { %v1106_v4 = vpop.xlane.xlu1 %1105  ;;  %v1104_v43 = vpop.xlane.xlu0 %1103  ;;  %1591 = vrsqrt.f32 %v1224_v26 }
 0x3ad   : > { %v1126_v63 = vmul.f32 0.03125, %v1106_v4  ;;  %v1125_v12 = vmul.f32 0.03125, %v1104_v43 }
 0x3af   : > { %v1158_v28 = vsub.f32 %v1126_v63, %v1142_v11  ;;  %v1157_v31 = vsub.f32 %v1125_v12, %v1141_v10  ;;  %v1582_v63 = vpop.eup %1581  ;;  %v1254_v11 = vmul.f32 %v2068_v32, %v2091_v21  ;;  %v1255_v12 = vmul.f32 %v2068_v32, %v2099_v30 }
 0x3b0   : > { %v1046_v52 = vpop.xlane.xlu1 %1045  ;;  %v1044_v53 = vpop.xlane.xlu0 %1043  ;;  %v1272_v30 = vsub.f32 %v2083_v8, %v1256_v17 }
 0x3b1   : > { %v2123_v57 = vmul.f32 0.03125, %v1044_v53  ;;  %v2129_v1 = vmul.f32 0.03125, %v1046_v52  ;;  %v1226_v36 = vadd.f32 1e-05, %v1158_v28  ;;  %v1225_v39 = vadd.f32 1e-05, %v1157_v31  ;;  %v1584_v9 = vpop.eup %1583 }
 0x3b2   : > { %v1270_v20 = vsub.f32 %v2077_v62, %v1254_v11  ;;  %v1257_v62 = vmul.f32 %v2068_v32, %v2103_v44 }
 0x3b3   : > { %v1143_v18 = vmul.f32 %v2123_v57, %v2123_v57  ;;  %v1144_v29 = vmul.f32 %v2129_v1, %v2129_v1  ;;  %1593 = vrsqrt.f32 %v1226_v36  ;;  %v1263_v8 = vmul.f32 %v2068_v32, %v2123_v57 }
 0x3b4   : > { %v1110_v13 = vpop.xlane.xlu1 %1109  ;;  %v1108_v16 = vpop.xlane.xlu0 %1107  ;;  %v1264_v60 = vmul.f32 %v2068_v32, %v2129_v1  ;;  %v1273_v44 = vsub.f32 %v2085_v14, %v1257_v62  ;;  %v1286_v57 = vmul.f32 %v1580_v49, %v1270_v20 }
 0x3b5   : > { %v1128_v22 = vmul.f32 0.03125, %v1110_v13  ;;  %v1127_v23 = vmul.f32 0.03125, %v1108_v16  ;;  %v1586_v13 = vpop.eup %1585  ;;  %v1269_v16 = vsub.f32 %v2073_v59, %v1253_v3  ;;  %v1260_v59 = vmul.f32 %v2068_v32, %v2113_v41 }
 0x3b6   : > { %v1259_v41 = vmul.f32 %v2068_v32, %v2109_v37 }
 0x3b7   : > { %v1159_v0 = vsub.f32 %v1127_v23, %v1143_v18  ;;  %v1160_v48 = vsub.f32 %v1128_v22, %v1144_v29  ;;  %v1588_v18 = vpop.eup %1587  ;;  %v1271_v22 = vsub.f32 %v2081_v7, %v1255_v12  ;;  %v1285_v10 = vmul.f32 %v1578_v35, %v1269_v16 }
 0x3b8   : > { %v1050_v33 = vpop.xlane.xlu1 %1049  ;;  %v1048_v4 = vpop.xlane.xlu0 %1047  ;;  %v1258_v7 = vmul.f32 %v2068_v32, %v2105_v45  ;;  %v1262_v29 = vmul.f32 %v2068_v32, %v2119_v51  ;;  %v1275_v37 = vsub.f32 %v2093_v24, %v1259_v41 }
 0x3b9   : > { %v2139_v43 = vmul.f32 0.03125, %v1050_v33  ;;  %v2141_v34 = vmul.f32 0.03125, %v1048_v4  ;;  %v1227_v38 = vadd.f32 1e-05, %v1159_v0  ;;  %v1228_v46 = vadd.f32 1e-05, %v1160_v48  ;;  %v1590_v21 = vpop.eup %1589 }
 0x3ba   : > { %v1592_v28 = vpop.eup %1591  ;;  %v1274_v31 = vsub.f32 %v2087_v15, %v1258_v7  ;;  %v1287_v35 = vmul.f32 %v1582_v63, %v1271_v22  ;;  %v1291_v15 = vmul.f32 %v1590_v21, %v1275_v37 }
 0x3bb   : > { %v1146_v42 = vmul.f32 %v2139_v43, %v2139_v43  ;;  %v1145_v50 = vmul.f32 %v2141_v34, %v2141_v34  ;;  %1595 = vrsqrt.f32 %v1227_v38  ;;  %v1265_v14 = vmul.f32 %v2068_v32, %v2141_v34 }
 0x3bc   : > { %v1114_v47 = vpop.xlane.xlu1 %1113  ;;  %v1112_v40 = vpop.xlane.xlu0 %1111  ;;  %1597 = vrsqrt.f32 %v1225_v39  ;;  %v1288_v39 = vmul.f32 %v1584_v9, %v1272_v30  ;;  %v1290_v1 = vmul.f32 %v1588_v18, %v1274_v31 }
 0x3bd   : > { %v1130_v52 = vmul.f32 0.03125, %v1114_v47  ;;  %v1129_v53 = vmul.f32 0.03125, %v1112_v40  ;;  %1599 = vrsqrt.f32 %v1228_v46  ;;  %v1594_v26 = vpop.eup %1593  ;;  %v1289_v46 = vmul.f32 %v1586_v13, %v1273_v44 }
 0x3bf   : > { %v1162_v54 = vsub.f32 %v1130_v52, %v1146_v42  ;;  %v1161_v55 = vsub.f32 %v1129_v53, %v1145_v50  ;;  %v1266_v50 = vmul.f32 %v2068_v32, %v2139_v43 }
 0x3c0   : > { %v1202_v56 = vpop.xlane.xlu1 %1201  ;;  %v1204_v58 = vpop.xlane.xlu0 %1203 }
 0x3c1   : > { %v1230_v5 = vadd.f32 1e-05, %v1162_v54  ;;  %v1229_v6 = vadd.f32 1e-05, %v1161_v55  ;;  %v1276_v19 = vsub.f32 %v1202_v56, %v1260_v59  ;;  %v1277_v0 = vsub.f32 %v1204_v58, %v1261_v27 }
 0x3c3   : > { %1601 = vrsqrt.f32 %v1230_v5  ;;  %v1292_v40 = vmul.f32 %v1592_v28, %v1276_v19 }
 0x3c4   : > { %1603 = vrsqrt.f32 %v1229_v6  ;;  %v1206_v23 = vpop.xlane.xlu1 %1205  ;;  %v1208_v25 = vpop.xlane.xlu0 %1207 }
 0x3c5   : > { %v1278_v45 = vsub.f32 %v1206_v23, %v1262_v29  ;;  %v1279_v48 = vsub.f32 %v1208_v25, %v1263_v8  ;;  %v1596_v4 = vpop.eup %1595 }
 0x3c6   : > { %v1598_v38 = vpop.eup %1597 }
 0x3c7   : > { %v1600_v47 = vpop.eup %1599  ;;  %v1293_v42 = vmul.f32 %v1598_v38, %v1277_v0  ;;  %v1294_v24 = vmul.f32 %v1594_v26, %v1278_v45  ;;  %v1295_v49 = vmul.f32 %v1596_v4, %v1279_v48 }
 0x3c8   : > { %v1210_v33 = vpop.xlane.xlu1 %1209  ;;  %v1212_v51 = vpop.xlane.xlu0 %1211 }
 0x3c9   : > { %v1280_v36 = vsub.f32 %v1210_v33, %v1264_v60  ;;  %v1281_v53 = vsub.f32 %v1212_v51, %v1265_v14 }
 0x3cb   : > { %v1296_v52 = vmul.f32 %v1600_v47, %v1280_v36 }
 0x3cc   : > { %v1214_v54 = vpop.xlane.xlu1 %1213  ;;  %v1301_v55 = vpop.permute.xlu0 %1300 }
 0x3cd   : > { %v1602_v34 = vpop.eup %1601  ;;  %v1282_v56 = vsub.f32 %v1214_v54, %v1266_v50  ;;  %v1303_v58 = vadd.f32 %v1301_v55, %v2079_v2  ;;  %v1304_v32 = vadd.f32 %v1301_v55, %v2075_v61  ;;  %v1305_v43 = vadd.f32 %v1301_v55, %v1285_v10 }
 0x3ce   : > { %v1604_v63 = vpop.eup %1603  ;;  %v1306_v3 = vadd.f32 %v1301_v55, %v1286_v57  ;;  %v1307_v5 = vadd.f32 %v1301_v55, %v1287_v35  ;;  %v1308_v6 = vadd.f32 %v1301_v55, %v1288_v39  ;;  %v1309_v9 = vadd.f32 %v1301_v55, %v1289_v46 }
 0x3cf   : > { %v1297_v11 = vmul.f32 %v1604_v63, %v1281_v53  ;;  %v1298_v12 = vmul.f32 %v1602_v34, %v1282_v56  ;;  %v1310_v13 = vadd.f32 %v1301_v55, %v1290_v1  ;;  %v1311_v16 = vadd.f32 %v1301_v55, %v1291_v15  ;;  %1320 = vst.msk [vmem:[%s2186_s21] sm:$0xff] %vm1319_vm1, %v1303_v58 }
 0x3d0   : > { %1321 = vst.msk [vmem:[%s2186_s21 + $0x8] sm:$0xff] %vm1319_vm1, %v1304_v32  ;;  %1322 = vst.msk [vmem:[%s2186_s21 + $0x10] sm:$0xff] %vm1319_vm1, %v1305_v43  ;;  %v1312_v61 = vadd.f32 %v1301_v55, %v1292_v40  ;;  %v1313_v2 = vadd.f32 %v1301_v55, %v1293_v42  ;;  %v1314_v17 = vadd.f32 %v1301_v55, %v1294_v24 }
 0x3d1   : > { %v1315_v18 = vadd.f32 %v1301_v55, %v1295_v49  ;;  %1323 = vst.msk [vmem:[%s2186_s21 + $0x18] sm:$0xff] %vm1319_vm1, %v1306_v3  ;;  %1324 = vst.msk [vmem:[%s2186_s21 + $0x20] sm:$0xff] %vm1319_vm1, %v1307_v5  ;;  %v1316_v20 = vadd.f32 %v1301_v55, %v1296_v52  ;;  %v1317_v22 = vadd.f32 %v1301_v55, %v1297_v11 }
 0x3d2   : > { %1325 = vst.msk [vmem:[%s2186_s21 + $0x28] sm:$0xff] %vm1319_vm1, %v1308_v6  ;;  %1326 = vst.msk [vmem:[%s2186_s21 + $0x30] sm:$0xff] %vm1319_vm1, %v1309_v9  ;;  %v1318_v23 = vadd.f32 %v1301_v55, %v1298_v12 }
 0x3d3   : > { %1327 = vst.msk [vmem:[%s2186_s21 + $0x38] sm:$0xff] %vm1319_vm1, %v1310_v13  ;;  %1328 = vst.msk [vmem:[%s2186_s21 + $0x40] sm:$0xff] %vm1319_vm1, %v1311_v16 }
 0x3d4   : > { %1329 = vst.msk [vmem:[%s2186_s21 + $0x48] sm:$0xff] %vm1319_vm1, %v1312_v61  ;;  %1330 = vst.msk [vmem:[%s2186_s21 + $0x50] sm:$0xff] %vm1319_vm1, %v1313_v2 }
 0x3d5   : > { %1331 = vst.msk [vmem:[%s2186_s21 + $0x58] sm:$0xff] %vm1319_vm1, %v1314_v17  ;;  %1332 = vst.msk [vmem:[%s2186_s21 + $0x60] sm:$0xff] %vm1319_vm1, %v1315_v18 }
 0x3d6   : > { %1333 = vst.msk [vmem:[%s2186_s21 + $0x68] sm:$0xff] %vm1319_vm1, %v1316_v20  ;;  %1334 = vst.msk [vmem:[%s2186_s21 + $0x70] sm:$0xff] %vm1319_vm1, %v1317_v22 }
 0x3d7   : > { %1335 = vst.msk [vmem:[%s2186_s21 + $0x78] sm:$0xff] %vm1319_vm1, %v1318_v23 }
 0x3d8 PF: > { %s17_s18 = sadd.s32 1, %s1675_s18  }
 0x3d9   : > { %p14_p7 = scmp.ge.s32.totalorder %s17_s18, 4  }
 0x3db   :  { %16 = sbr.rel (!%p14_p7) target bundleno = 2 (0x2), region = 79 }
 0x3e2   :  { %1358 = vsyncpa [#allocation3], 1 }
 0x3e3   :  { %1360 = vsyncpa [#allocation3 + $0x1], 1 }
 0x3e4   :  { %1361 = vsyncpa [#allocation5], 1 }

</bundles_post_ra>
